<compile_context>
chip_gen: v7x
topology: tpu7x:2x2x1
jax: 0.10.0
libtpu: 0.0.40
codegen_flags: <defaults>
</compile_context>

<pallas_src>
import jax
import jax.numpy as jnp
from jax.experimental import pallas as pl
from jax.experimental.pallas import tpu as pltpu

VOCAB = 5000
HIDDEN = 32          # real hidden size (matches PyTorch config)
CLASS_NUM = 3
BATCH = 2
SEQ = 8

GP = 4 * HIDDEN      # 128: packed gate width (i|f|g|o), already lane-dense
B_PAD = 8            # batch padded to f32 sublane granularity
OUT_PAD = 128        # lane-dense output slab width


def lstm_model_kernel(ids_ref,     # SMEM  (BATCH, SEQ) int32          (scalar prefetch)
                      eproj_hbm,   # HBM   (VOCAB, GP) f32  E @ W_ih^T + b   (pl.ANY)
                      whh_ref,     # VMEM  (HIDDEN, GP) f32  W_hh^T, gate cols i|f|g|o
                      wlin_ref,    # VMEM  (HIDDEN, OUT_PAD) f32  zero-padded W_lin^T
                      blin_ref,    # VMEM  (1, OUT_PAD) f32
                      out_ref,     # VMEM  (B_PAD, OUT_PAD) f32
                      xproj_ref,   # scratch VMEM (SEQ*B_PAD, GP) f32
                      dma_sems):   # scratch DMA semaphores (SEQ*BATCH,)
    # Pad-batch rows (b >= BATCH) are never written by the gather DMAs below;
    # zero them so nothing downstream sees stale VMEM.  (They are row-isolated
    # through the whole recurrence and sliced off in the wrapper, but keep
    # them deterministic.)
    for t in range(SEQ):
        xproj_ref[pl.ds(t * B_PAD + BATCH, B_PAD - BATCH), :] = jnp.zeros(
            (B_PAD - BATCH, GP), jnp.float32)

    # Fused embedding gather + input projection: DMA only the 16 needed rows
    # of the pre-projected table E' straight into the gate-preactivation
    # scratch (time-major: row = t * B_PAD + b).  Start all DMAs, then wait.
    copies = []
    for t in range(SEQ):
        for b in range(BATCH):
            idx = jnp.clip(ids_ref[b, t], 0, VOCAB - 1)   # both-side clamp
            cp = pltpu.make_async_copy(
                eproj_hbm.at[pl.ds(idx, 1), :],
                xproj_ref.at[pl.ds(t * B_PAD + b, 1), :],
                dma_sems.at[t * BATCH + b])
            cp.start()
            copies.append(cp)
    for cp in copies:
        cp.wait()

    # Single-EUP-op sigmoid (exact identity, avoids exp + divide lowering).
    sigmoid = lambda x: 0.5 * (jnp.tanh(0.5 * x) + 1.0)

    # LSTM recurrence.  PyTorch gate order along the 4H axis: i, f, g, o at
    # lane offsets 0/32/64/96.  Only h @ W_hh sits on the serial chain and the
    # t = 0 matmul is skipped entirely (h0 = 0).
    # TODO(synk): if the bundle dump shows Mosaic re-streaming W_hh into the
    # MXU every step, switch to pltpu.matmul_push_rhs/acc_lhs/pop to keep the
    # (32,128) RHS resident across the 8 steps.
    h = None
    c = None
    for t in range(SEQ):
        gates = xproj_ref[pl.ds(t * B_PAD, B_PAD), :]          # (B_PAD, GP)
        if t > 0:
            gates = gates + jnp.dot(h, whh_ref[...],
                                    preferred_element_type=jnp.float32)
        i_g = sigmoid(gates[:, 0 * HIDDEN:1 * HIDDEN])
        g_g = jnp.tanh(gates[:, 2 * HIDDEN:3 * HIDDEN])
        o_g = sigmoid(gates[:, 3 * HIDDEN:4 * HIDDEN])
        if t == 0:
            c = i_g * g_g                                       # c0 = 0 => f*c vanishes
        else:
            f_g = sigmoid(gates[:, 1 * HIDDEN:2 * HIDDEN])
            c = f_g * c + i_g * g_g
        h = o_g * jnp.tanh(c)                                   # (B_PAD, HIDDEN)

    # Classifier head: Linear + Sigmoid, lane-dense (8, 128) store.
    logits = (jnp.dot(h, wlin_ref[...], preferred_element_type=jnp.float32)
              + blin_ref[...])
    out_ref[...] = sigmoid(logits)


def init_params(key):
    """PyTorch-layout parameters (weight_ih_l0 / weight_hh_l0 / linear)."""
    ks = jax.random.split(key, 7)
    bound = 1.0 / float(jnp.sqrt(HIDDEN))
    u = lambda k, shape: jax.random.uniform(k, shape, jnp.float32, -bound, bound)
    return {
        "embedding": jax.random.normal(ks[0], (VOCAB, HIDDEN), jnp.float32),
        "w_ih": u(ks[1], (4 * HIDDEN, HIDDEN)),
        "w_hh": u(ks[2], (4 * HIDDEN, HIDDEN)),
        "b_ih": u(ks[3], (4 * HIDDEN,)),
        "b_hh": u(ks[4], (4 * HIDDEN,)),
        "w_lin": u(ks[5], (CLASS_NUM, HIDDEN)),
        "b_lin": u(ks[6], (CLASS_NUM,)),
    }


def prepare_params(p):
    """One-time weight prep (off the hot path).

    * Folds W_ih and the fused LSTM bias into the embedding table:
        E' = E @ W_ih^T + (b_ih + b_hh)   -> (VOCAB, GP), kept in HBM.
    * W_hh is just transposed (HIDDEN, GP) — gate columns i|f|g|o, no padding.
    * Linear head is transposed and zero-padded to a lane-dense OUT_PAD slab.
    """
    wih_t = p["w_ih"].T.astype(jnp.float32)              # (H, 4H) cols i|f|g|o
    whh_t = p["w_hh"].T.astype(jnp.float32)              # (H, 4H)
    bias = (p["b_ih"] + p["b_hh"]).astype(jnp.float32)   # (4H,)

    eproj = p["embedding"].astype(jnp.float32) @ wih_t + bias[None, :]  # (VOCAB, GP)

    wlin_p = jnp.zeros((HIDDEN, OUT_PAD), jnp.float32).at[:, :CLASS_NUM].set(
        p["w_lin"].T.astype(jnp.float32))
    blin_p = jnp.zeros((1, OUT_PAD), jnp.float32).at[0, :CLASS_NUM].set(
        p["b_lin"].astype(jnp.float32))

    return {"eproj": eproj, "whh": whh_t, "wlin": wlin_p, "blin": blin_p}


@jax.jit
def forward(token_ids, kp):
    y_pad = pl.pallas_call(
        lstm_model_kernel,
        out_shape=jax.ShapeDtypeStruct((B_PAD, OUT_PAD), jnp.float32),
        grid_spec=pltpu.PrefetchScalarGridSpec(
            num_scalar_prefetch=1,
            grid=(1,),
            in_specs=[
                pl.BlockSpec(memory_space=pl.ANY),                       # E' stays in HBM
                pl.BlockSpec((HIDDEN, GP), lambda i, ids: (0, 0)),       # W_hh^T
                pl.BlockSpec((HIDDEN, OUT_PAD), lambda i, ids: (0, 0)),  # W_lin^T (padded)
                pl.BlockSpec((1, OUT_PAD), lambda i, ids: (0, 0)),       # b_lin (padded)
            ],
            out_specs=pl.BlockSpec((B_PAD, OUT_PAD), lambda i, ids: (0, 0)),
            scratch_shapes=[
                pltpu.VMEM((SEQ * B_PAD, GP), jnp.float32),   # gate preactivations
                pltpu.SemaphoreType.DMA((SEQ * BATCH,)),      # one sem per gathered row
            ],
        ),
        compiler_params=pltpu.CompilerParams(
            dimension_semantics=("arbitrary",)),
    )(token_ids, kp["eproj"], kp["whh"], kp["wlin"], kp["blin"])
    # Slice off batch / class padding.
    return y_pad[:BATCH, :CLASS_NUM]


@jax.jit
def forward_with_loss(token_ids, y, kp):
    y_pred = forward(token_ids, kp)
    # nn.MSELoss (mean reduction) — trivial reduction kept as JAX glue.
    return jnp.mean((y_pred - y) ** 2)


if __name__ == "__main__":
    key = jax.random.PRNGKey(0)
    k_param, k_x, k_y = jax.random.split(key, 3)
    params = init_params(k_param)
    kparams = prepare_params(params)   # one-time weight fold/prep, not in the hot path

    token_ids = jax.random.randint(k_x, (BATCH, SEQ), 0, VOCAB, dtype=jnp.int32)
    y_true = jax.random.uniform(k_y, (BATCH, CLASS_NUM), dtype=jnp.float32)

    y_pred = forward(token_ids, kparams)
    loss = forward_with_loss(token_ids, y_true, kparams)

    jax.block_until_ready(y_pred)
    jax.block_until_ready(loss)
    assert y_pred.shape == (BATCH, CLASS_NUM)
    assert bool(jnp.all(jnp.isfinite(y_pred)))
    assert bool(jnp.isfinite(loss))
    print("KERNEL_OK")
</pallas_src>

<mosaic_0001>
module attributes {stable_mosaic.version = 11 : i64} {
  func.func @lstm_model_kernel(%arg0: i32, %arg1: memref<2x8xi32, #tpu.memory_space<smem>>, %arg2: memref<5000x128xf32, #tpu.memory_space<any>>, %arg3: memref<32x128xf32, #tpu.memory_space<vmem>>, %arg4: memref<32x128xf32, #tpu.memory_space<vmem>>, %arg5: memref<1x128xf32, #tpu.memory_space<vmem>>, %arg6: memref<8x128xf32, #tpu.memory_space<vmem>>, %arg7: memref<64x128xf32, #tpu.memory_space<vmem>>, %arg8: memref<16x!tpu.dma_semaphore, #tpu.memory_space<semaphore_mem>>) attributes {dimension_semantics = [#tpu.dimension_semantics<arbitrary>], iteration_bounds = array<i64: 1>, scalar_prefetch = 1 : i64, scratch_operands = 2 : i64, tpu.core_type = #tpu.core_type<tc>, window_params = [{}, {pipeline_mode = #tpu.pipeline_mode<synchronous>, transform_indices = @transform_1, window_bounds = array<i64: 32, 128>}, {pipeline_mode = #tpu.pipeline_mode<synchronous>, transform_indices = @transform_2, window_bounds = array<i64: 32, 128>}, {pipeline_mode = #tpu.pipeline_mode<synchronous>, transform_indices = @transform_3, window_bounds = array<i64: 1, 128>}, {pipeline_mode = #tpu.pipeline_mode<synchronous>, transform_indices = @transform_4, window_bounds = array<i64: 8, 128>}]} {
    %cst = arith.constant 0.000000e+00 : f32
    %0 = vector.broadcast %cst : f32 to vector<6x128xf32>
    %c2 = arith.constant 2 : index
    %c0 = arith.constant 0 : index
    %1 = vector.load %arg7[%c2, %c0] : memref<64x128xf32, #tpu.memory_space<vmem>>, vector<6x128xf32>
    tpu.vector_store %arg7[%c2, %c0], %0 {strides = array<i32>} : memref<64x128xf32, #tpu.memory_space<vmem>>, vector<6x128xf32>,
    %cst_0 = arith.constant 0.000000e+00 : f32
    %2 = vector.broadcast %cst_0 : f32 to vector<6x128xf32>
    %c10 = arith.constant 10 : index
    %c0_1 = arith.constant 0 : index
    %3 = vector.load %arg7[%c10, %c0_1] : memref<64x128xf32, #tpu.memory_space<vmem>>, vector<6x128xf32>
    tpu.vector_store %arg7[%c10, %c0_1], %2 {strides = array<i32>} : memref<64x128xf32, #tpu.memory_space<vmem>>, vector<6x128xf32>,
    %cst_2 = arith.constant 0.000000e+00 : f32
    %4 = vector.broadcast %cst_2 : f32 to vector<6x128xf32>
    %c18 = arith.constant 18 : index
    %c0_3 = arith.constant 0 : index
    %5 = vector.load %arg7[%c18, %c0_3] : memref<64x128xf32, #tpu.memory_space<vmem>>, vector<6x128xf32>
    tpu.vector_store %arg7[%c18, %c0_3], %4 {strides = array<i32>} : memref<64x128xf32, #tpu.memory_space<vmem>>, vector<6x128xf32>,
    %cst_4 = arith.constant 0.000000e+00 : f32
    %6 = vector.broadcast %cst_4 : f32 to vector<6x128xf32>
    %c26 = arith.constant 26 : index
    %c0_5 = arith.constant 0 : index
    %7 = vector.load %arg7[%c26, %c0_5] : memref<64x128xf32, #tpu.memory_space<vmem>>, vector<6x128xf32>
    tpu.vector_store %arg7[%c26, %c0_5], %6 {strides = array<i32>} : memref<64x128xf32, #tpu.memory_space<vmem>>, vector<6x128xf32>,
    %cst_6 = arith.constant 0.000000e+00 : f32
    %8 = vector.broadcast %cst_6 : f32 to vector<6x128xf32>
    %c34 = arith.constant 34 : index
    %c0_7 = arith.constant 0 : index
    %9 = vector.load %arg7[%c34, %c0_7] : memref<64x128xf32, #tpu.memory_space<vmem>>, vector<6x128xf32>
    tpu.vector_store %arg7[%c34, %c0_7], %8 {strides = array<i32>} : memref<64x128xf32, #tpu.memory_space<vmem>>, vector<6x128xf32>,
    %cst_8 = arith.constant 0.000000e+00 : f32
    %10 = vector.broadcast %cst_8 : f32 to vector<6x128xf32>
    %c42 = arith.constant 42 : index
    %c0_9 = arith.constant 0 : index
    %11 = vector.load %arg7[%c42, %c0_9] : memref<64x128xf32, #tpu.memory_space<vmem>>, vector<6x128xf32>
    tpu.vector_store %arg7[%c42, %c0_9], %10 {strides = array<i32>} : memref<64x128xf32, #tpu.memory_space<vmem>>, vector<6x128xf32>,
    %cst_10 = arith.constant 0.000000e+00 : f32
    %12 = vector.broadcast %cst_10 : f32 to vector<6x128xf32>
    %c50 = arith.constant 50 : index
    %c0_11 = arith.constant 0 : index
    %13 = vector.load %arg7[%c50, %c0_11] : memref<64x128xf32, #tpu.memory_space<vmem>>, vector<6x128xf32>
    tpu.vector_store %arg7[%c50, %c0_11], %12 {strides = array<i32>} : memref<64x128xf32, #tpu.memory_space<vmem>>, vector<6x128xf32>,
    %cst_12 = arith.constant 0.000000e+00 : f32
    %14 = vector.broadcast %cst_12 : f32 to vector<6x128xf32>
    %c58 = arith.constant 58 : index
    %c0_13 = arith.constant 0 : index
    %15 = vector.load %arg7[%c58, %c0_13] : memref<64x128xf32, #tpu.memory_space<vmem>>, vector<6x128xf32>
    tpu.vector_store %arg7[%c58, %c0_13], %14 {strides = array<i32>} : memref<64x128xf32, #tpu.memory_space<vmem>>, vector<6x128xf32>,
    %c0_14 = arith.constant 0 : index
    %c0_15 = arith.constant 0 : index
    %16 = memref.load %arg1[%c0_14, %c0_15] : memref<2x8xi32, #tpu.memory_space<smem>>
    %c0_i32 = arith.constant 0 : i32
    %c4999_i32 = arith.constant 4999 : i32
    %17 = arith.maxsi %c0_i32, %16 : i32
    %18 = arith.minsi %c4999_i32, %17 : i32
    %c0_i32_16 = arith.constant 0 : i32
    %c0_i32_17 = arith.constant 0 : i32
    %19 = tpu.memref_slice %arg2[%18, %c0_i32_17] : memref<5000x128xf32, #tpu.memory_space<any>> -> memref<1x128xf32, #tpu.memory_space<any>>
    %c0_i32_18 = arith.constant 0 : i32
    %c0_i32_19 = arith.constant 0 : i32
    %20 = tpu.memref_slice %arg7[%c0_i32_18, %c0_i32_19] : memref<64x128xf32, #tpu.memory_space<vmem>> -> memref<1x128xf32, #tpu.memory_space<vmem>>
    %21 = tpu.memref_slice %arg8[%c0_i32_16] : memref<16x!tpu.dma_semaphore, #tpu.memory_space<semaphore_mem>> -> memref<1x!tpu.dma_semaphore, #tpu.memory_space<semaphore_mem>>
    %22 = tpu.memref_squeeze %21 : memref<1x!tpu.dma_semaphore, #tpu.memory_space<semaphore_mem>> -> memref<!tpu.dma_semaphore, #tpu.memory_space<semaphore_mem>>
    tpu.enqueue_dma source(%19 : memref<1x128xf32, #tpu.memory_space<any>>) target(%20 : memref<1x128xf32, #tpu.memory_space<vmem>>) target_semaphore(%22 : memref<!tpu.dma_semaphore, #tpu.memory_space<semaphore_mem>>)
    %c1 = arith.constant 1 : index
    %c0_20 = arith.constant 0 : index
    %23 = memref.load %arg1[%c1, %c0_20] : memref<2x8xi32, #tpu.memory_space<smem>>
    %c0_i32_21 = arith.constant 0 : i32
    %c4999_i32_22 = arith.constant 4999 : i32
    %24 = arith.maxsi %c0_i32_21, %23 : i32
    %25 = arith.minsi %c4999_i32_22, %24 : i32
    %c1_i32 = arith.constant 1 : i32
    %c0_i32_23 = arith.constant 0 : i32
    %26 = tpu.memref_slice %arg2[%25, %c0_i32_23] : memref<5000x128xf32, #tpu.memory_space<any>> -> memref<1x128xf32, #tpu.memory_space<any>>
    %c1_i32_24 = arith.constant 1 : i32
    %c0_i32_25 = arith.constant 0 : i32
    %27 = tpu.memref_slice %arg7[%c1_i32_24, %c0_i32_25] : memref<64x128xf32, #tpu.memory_space<vmem>> -> memref<1x128xf32, #tpu.memory_space<vmem>>
    %28 = tpu.memref_slice %arg8[%c1_i32] : memref<16x!tpu.dma_semaphore, #tpu.memory_space<semaphore_mem>> -> memref<1x!tpu.dma_semaphore, #tpu.memory_space<semaphore_mem>>
    %29 = tpu.memref_squeeze %28 : memref<1x!tpu.dma_semaphore, #tpu.memory_space<semaphore_mem>> -> memref<!tpu.dma_semaphore, #tpu.memory_space<semaphore_mem>>
    tpu.enqueue_dma source(%26 : memref<1x128xf32, #tpu.memory_space<any>>) target(%27 : memref<1x128xf32, #tpu.memory_space<vmem>>) target_semaphore(%29 : memref<!tpu.dma_semaphore, #tpu.memory_space<semaphore_mem>>)
    %c0_26 = arith.constant 0 : index
    %c1_27 = arith.constant 1 : index
    %30 = memref.load %arg1[%c0_26, %c1_27] : memref<2x8xi32, #tpu.memory_space<smem>>
    %c0_i32_28 = arith.constant 0 : i32
    %c4999_i32_29 = arith.constant 4999 : i32
    %31 = arith.maxsi %c0_i32_28, %30 : i32
    %32 = arith.minsi %c4999_i32_29, %31 : i32
    %c2_i32 = arith.constant 2 : i32
    %c0_i32_30 = arith.constant 0 : i32
    %33 = tpu.memref_slice %arg2[%32, %c0_i32_30] : memref<5000x128xf32, #tpu.memory_space<any>> -> memref<1x128xf32, #tpu.memory_space<any>>
    %c8_i32 = arith.constant 8 : i32
    %c0_i32_31 = arith.constant 0 : i32
    %34 = tpu.memref_slice %arg7[%c8_i32, %c0_i32_31] : memref<64x128xf32, #tpu.memory_space<vmem>> -> memref<1x128xf32, #tpu.memory_space<vmem>>
    %35 = tpu.memref_slice %arg8[%c2_i32] : memref<16x!tpu.dma_semaphore, #tpu.memory_space<semaphore_mem>> -> memref<1x!tpu.dma_semaphore, #tpu.memory_space<semaphore_mem>>
    %36 = tpu.memref_squeeze %35 : memref<1x!tpu.dma_semaphore, #tpu.memory_space<semaphore_mem>> -> memref<!tpu.dma_semaphore, #tpu.memory_space<semaphore_mem>>
    tpu.enqueue_dma source(%33 : memref<1x128xf32, #tpu.memory_space<any>>) target(%34 : memref<1x128xf32, #tpu.memory_space<vmem>>) target_semaphore(%36 : memref<!tpu.dma_semaphore, #tpu.memory_space<semaphore_mem>>)
    %c1_32 = arith.constant 1 : index
    %c1_33 = arith.constant 1 : index
    %37 = memref.load %arg1[%c1_32, %c1_33] : memref<2x8xi32, #tpu.memory_space<smem>>
    %c0_i32_34 = arith.constant 0 : i32
    %c4999_i32_35 = arith.constant 4999 : i32
    %38 = arith.maxsi %c0_i32_34, %37 : i32
    %39 = arith.minsi %c4999_i32_35, %38 : i32
    %c3_i32 = arith.constant 3 : i32
    %c0_i32_36 = arith.constant 0 : i32
    %40 = tpu.memref_slice %arg2[%39, %c0_i32_36] : memref<5000x128xf32, #tpu.memory_space<any>> -> memref<1x128xf32, #tpu.memory_space<any>>
    %c9_i32 = arith.constant 9 : i32
    %c0_i32_37 = arith.constant 0 : i32
    %41 = tpu.memref_slice %arg7[%c9_i32, %c0_i32_37] : memref<64x128xf32, #tpu.memory_space<vmem>> -> memref<1x128xf32, #tpu.memory_space<vmem>>
    %42 = tpu.memref_slice %arg8[%c3_i32] : memref<16x!tpu.dma_semaphore, #tpu.memory_space<semaphore_mem>> -> memref<1x!tpu.dma_semaphore, #tpu.memory_space<semaphore_mem>>
    %43 = tpu.memref_squeeze %42 : memref<1x!tpu.dma_semaphore, #tpu.memory_space<semaphore_mem>> -> memref<!tpu.dma_semaphore, #tpu.memory_space<semaphore_mem>>
    tpu.enqueue_dma source(%40 : memref<1x128xf32, #tpu.memory_space<any>>) target(%41 : memref<1x128xf32, #tpu.memory_space<vmem>>) target_semaphore(%43 : memref<!tpu.dma_semaphore, #tpu.memory_space<semaphore_mem>>)
    %c0_38 = arith.constant 0 : index
    %c2_39 = arith.constant 2 : index
    %44 = memref.load %arg1[%c0_38, %c2_39] : memref<2x8xi32, #tpu.memory_space<smem>>
    %c0_i32_40 = arith.constant 0 : i32
    %c4999_i32_41 = arith.constant 4999 : i32
    %45 = arith.maxsi %c0_i32_40, %44 : i32
    %46 = arith.minsi %c4999_i32_41, %45 : i32
    %c4_i32 = arith.constant 4 : i32
    %c0_i32_42 = arith.constant 0 : i32
    %47 = tpu.memref_slice %arg2[%46, %c0_i32_42] : memref<5000x128xf32, #tpu.memory_space<any>> -> memref<1x128xf32, #tpu.memory_space<any>>
    %c16_i32 = arith.constant 16 : i32
    %c0_i32_43 = arith.constant 0 : i32
    %48 = tpu.memref_slice %arg7[%c16_i32, %c0_i32_43] : memref<64x128xf32, #tpu.memory_space<vmem>> -> memref<1x128xf32, #tpu.memory_space<vmem>>
    %49 = tpu.memref_slice %arg8[%c4_i32] : memref<16x!tpu.dma_semaphore, #tpu.memory_space<semaphore_mem>> -> memref<1x!tpu.dma_semaphore, #tpu.memory_space<semaphore_mem>>
    %50 = tpu.memref_squeeze %49 : memref<1x!tpu.dma_semaphore, #tpu.memory_space<semaphore_mem>> -> memref<!tpu.dma_semaphore, #tpu.memory_space<semaphore_mem>>
    tpu.enqueue_dma source(%47 : memref<1x128xf32, #tpu.memory_space<any>>) target(%48 : memref<1x128xf32, #tpu.memory_space<vmem>>) target_semaphore(%50 : memref<!tpu.dma_semaphore, #tpu.memory_space<semaphore_mem>>)
    %c1_44 = arith.constant 1 : index
    %c2_45 = arith.constant 2 : index
    %51 = memref.load %arg1[%c1_44, %c2_45] : memref<2x8xi32, #tpu.memory_space<smem>>
    %c0_i32_46 = arith.constant 0 : i32
    %c4999_i32_47 = arith.constant 4999 : i32
    %52 = arith.maxsi %c0_i32_46, %51 : i32
    %53 = arith.minsi %c4999_i32_47, %52 : i32
    %c5_i32 = arith.constant 5 : i32
    %c0_i32_48 = arith.constant 0 : i32
    %54 = tpu.memref_slice %arg2[%53, %c0_i32_48] : memref<5000x128xf32, #tpu.memory_space<any>> -> memref<1x128xf32, #tpu.memory_space<any>>
    %c17_i32 = arith.constant 17 : i32
    %c0_i32_49 = arith.constant 0 : i32
    %55 = tpu.memref_slice %arg7[%c17_i32, %c0_i32_49] : memref<64x128xf32, #tpu.memory_space<vmem>> -> memref<1x128xf32, #tpu.memory_space<vmem>>
    %56 = tpu.memref_slice %arg8[%c5_i32] : memref<16x!tpu.dma_semaphore, #tpu.memory_space<semaphore_mem>> -> memref<1x!tpu.dma_semaphore, #tpu.memory_space<semaphore_mem>>
    %57 = tpu.memref_squeeze %56 : memref<1x!tpu.dma_semaphore, #tpu.memory_space<semaphore_mem>> -> memref<!tpu.dma_semaphore, #tpu.memory_space<semaphore_mem>>
    tpu.enqueue_dma source(%54 : memref<1x128xf32, #tpu.memory_space<any>>) target(%55 : memref<1x128xf32, #tpu.memory_space<vmem>>) target_semaphore(%57 : memref<!tpu.dma_semaphore, #tpu.memory_space<semaphore_mem>>)
    %c0_50 = arith.constant 0 : index
    %c3 = arith.constant 3 : index
    %58 = memref.load %arg1[%c0_50, %c3] : memref<2x8xi32, #tpu.memory_space<smem>>
    %c0_i32_51 = arith.constant 0 : i32
    %c4999_i32_52 = arith.constant 4999 : i32
    %59 = arith.maxsi %c0_i32_51, %58 : i32
    %60 = arith.minsi %c4999_i32_52, %59 : i32
    %c6_i32 = arith.constant 6 : i32
    %c0_i32_53 = arith.constant 0 : i32
    %61 = tpu.memref_slice %arg2[%60, %c0_i32_53] : memref<5000x128xf32, #tpu.memory_space<any>> -> memref<1x128xf32, #tpu.memory_space<any>>
    %c24_i32 = arith.constant 24 : i32
    %c0_i32_54 = arith.constant 0 : i32
    %62 = tpu.memref_slice %arg7[%c24_i32, %c0_i32_54] : memref<64x128xf32, #tpu.memory_space<vmem>> -> memref<1x128xf32, #tpu.memory_space<vmem>>
    %63 = tpu.memref_slice %arg8[%c6_i32] : memref<16x!tpu.dma_semaphore, #tpu.memory_space<semaphore_mem>> -> memref<1x!tpu.dma_semaphore, #tpu.memory_space<semaphore_mem>>
    %64 = tpu.memref_squeeze %63 : memref<1x!tpu.dma_semaphore, #tpu.memory_space<semaphore_mem>> -> memref<!tpu.dma_semaphore, #tpu.memory_space<semaphore_mem>>
    tpu.enqueue_dma source(%61 : memref<1x128xf32, #tpu.memory_space<any>>) target(%62 : memref<1x128xf32, #tpu.memory_space<vmem>>) target_semaphore(%64 : memref<!tpu.dma_semaphore, #tpu.memory_space<semaphore_mem>>)
    %c1_55 = arith.constant 1 : index
    %c3_56 = arith.constant 3 : index
    %65 = memref.load %arg1[%c1_55, %c3_56] : memref<2x8xi32, #tpu.memory_space<smem>>
    %c0_i32_57 = arith.constant 0 : i32
    %c4999_i32_58 = arith.constant 4999 : i32
    %66 = arith.maxsi %c0_i32_57, %65 : i32
    %67 = arith.minsi %c4999_i32_58, %66 : i32
    %c7_i32 = arith.constant 7 : i32
    %c0_i32_59 = arith.constant 0 : i32
    %68 = tpu.memref_slice %arg2[%67, %c0_i32_59] : memref<5000x128xf32, #tpu.memory_space<any>> -> memref<1x128xf32, #tpu.memory_space<any>>
    %c25_i32 = arith.constant 25 : i32
    %c0_i32_60 = arith.constant 0 : i32
    %69 = tpu.memref_slice %arg7[%c25_i32, %c0_i32_60] : memref<64x128xf32, #tpu.memory_space<vmem>> -> memref<1x128xf32, #tpu.memory_space<vmem>>
    %70 = tpu.memref_slice %arg8[%c7_i32] : memref<16x!tpu.dma_semaphore, #tpu.memory_space<semaphore_mem>> -> memref<1x!tpu.dma_semaphore, #tpu.memory_space<semaphore_mem>>
    %71 = tpu.memref_squeeze %70 : memref<1x!tpu.dma_semaphore, #tpu.memory_space<semaphore_mem>> -> memref<!tpu.dma_semaphore, #tpu.memory_space<semaphore_mem>>
    tpu.enqueue_dma source(%68 : memref<1x128xf32, #tpu.memory_space<any>>) target(%69 : memref<1x128xf32, #tpu.memory_space<vmem>>) target_semaphore(%71 : memref<!tpu.dma_semaphore, #tpu.memory_space<semaphore_mem>>)
    %c0_61 = arith.constant 0 : index
    %c4 = arith.constant 4 : index
    %72 = memref.load %arg1[%c0_61, %c4] : memref<2x8xi32, #tpu.memory_space<smem>>
    %c0_i32_62 = arith.constant 0 : i32
    %c4999_i32_63 = arith.constant 4999 : i32
    %73 = arith.maxsi %c0_i32_62, %72 : i32
    %74 = arith.minsi %c4999_i32_63, %73 : i32
    %c8_i32_64 = arith.constant 8 : i32
    %c0_i32_65 = arith.constant 0 : i32
    %75 = tpu.memref_slice %arg2[%74, %c0_i32_65] : memref<5000x128xf32, #tpu.memory_space<any>> -> memref<1x128xf32, #tpu.memory_space<any>>
    %c32_i32 = arith.constant 32 : i32
    %c0_i32_66 = arith.constant 0 : i32
    %76 = tpu.memref_slice %arg7[%c32_i32, %c0_i32_66] : memref<64x128xf32, #tpu.memory_space<vmem>> -> memref<1x128xf32, #tpu.memory_space<vmem>>
    %77 = tpu.memref_slice %arg8[%c8_i32_64] : memref<16x!tpu.dma_semaphore, #tpu.memory_space<semaphore_mem>> -> memref<1x!tpu.dma_semaphore, #tpu.memory_space<semaphore_mem>>
    %78 = tpu.memref_squeeze %77 : memref<1x!tpu.dma_semaphore, #tpu.memory_space<semaphore_mem>> -> memref<!tpu.dma_semaphore, #tpu.memory_space<semaphore_mem>>
    tpu.enqueue_dma source(%75 : memref<1x128xf32, #tpu.memory_space<any>>) target(%76 : memref<1x128xf32, #tpu.memory_space<vmem>>) target_semaphore(%78 : memref<!tpu.dma_semaphore, #tpu.memory_space<semaphore_mem>>)
    %c1_67 = arith.constant 1 : index
    %c4_68 = arith.constant 4 : index
    %79 = memref.load %arg1[%c1_67, %c4_68] : memref<2x8xi32, #tpu.memory_space<smem>>
    %c0_i32_69 = arith.constant 0 : i32
    %c4999_i32_70 = arith.constant 4999 : i32
    %80 = arith.maxsi %c0_i32_69, %79 : i32
    %81 = arith.minsi %c4999_i32_70, %80 : i32
    %c9_i32_71 = arith.constant 9 : i32
    %c0_i32_72 = arith.constant 0 : i32
    %82 = tpu.memref_slice %arg2[%81, %c0_i32_72] : memref<5000x128xf32, #tpu.memory_space<any>> -> memref<1x128xf32, #tpu.memory_space<any>>
    %c33_i32 = arith.constant 33 : i32
    %c0_i32_73 = arith.constant 0 : i32
    %83 = tpu.memref_slice %arg7[%c33_i32, %c0_i32_73] : memref<64x128xf32, #tpu.memory_space<vmem>> -> memref<1x128xf32, #tpu.memory_space<vmem>>
    %84 = tpu.memref_slice %arg8[%c9_i32_71] : memref<16x!tpu.dma_semaphore, #tpu.memory_space<semaphore_mem>> -> memref<1x!tpu.dma_semaphore, #tpu.memory_space<semaphore_mem>>
    %85 = tpu.memref_squeeze %84 : memref<1x!tpu.dma_semaphore, #tpu.memory_space<semaphore_mem>> -> memref<!tpu.dma_semaphore, #tpu.memory_space<semaphore_mem>>
    tpu.enqueue_dma source(%82 : memref<1x128xf32, #tpu.memory_space<any>>) target(%83 : memref<1x128xf32, #tpu.memory_space<vmem>>) target_semaphore(%85 : memref<!tpu.dma_semaphore, #tpu.memory_space<semaphore_mem>>)
    %c0_74 = arith.constant 0 : index
    %c5 = arith.constant 5 : index
    %86 = memref.load %arg1[%c0_74, %c5] : memref<2x8xi32, #tpu.memory_space<smem>>
    %c0_i32_75 = arith.constant 0 : i32
    %c4999_i32_76 = arith.constant 4999 : i32
    %87 = arith.maxsi %c0_i32_75, %86 : i32
    %88 = arith.minsi %c4999_i32_76, %87 : i32
    %c10_i32 = arith.constant 10 : i32
    %c0_i32_77 = arith.constant 0 : i32
    %89 = tpu.memref_slice %arg2[%88, %c0_i32_77] : memref<5000x128xf32, #tpu.memory_space<any>> -> memref<1x128xf32, #tpu.memory_space<any>>
    %c40_i32 = arith.constant 40 : i32
    %c0_i32_78 = arith.constant 0 : i32
    %90 = tpu.memref_slice %arg7[%c40_i32, %c0_i32_78] : memref<64x128xf32, #tpu.memory_space<vmem>> -> memref<1x128xf32, #tpu.memory_space<vmem>>
    %91 = tpu.memref_slice %arg8[%c10_i32] : memref<16x!tpu.dma_semaphore, #tpu.memory_space<semaphore_mem>> -> memref<1x!tpu.dma_semaphore, #tpu.memory_space<semaphore_mem>>
    %92 = tpu.memref_squeeze %91 : memref<1x!tpu.dma_semaphore, #tpu.memory_space<semaphore_mem>> -> memref<!tpu.dma_semaphore, #tpu.memory_space<semaphore_mem>>
    tpu.enqueue_dma source(%89 : memref<1x128xf32, #tpu.memory_space<any>>) target(%90 : memref<1x128xf32, #tpu.memory_space<vmem>>) target_semaphore(%92 : memref<!tpu.dma_semaphore, #tpu.memory_space<semaphore_mem>>)
    %c1_79 = arith.constant 1 : index
    %c5_80 = arith.constant 5 : index
    %93 = memref.load %arg1[%c1_79, %c5_80] : memref<2x8xi32, #tpu.memory_space<smem>>
    %c0_i32_81 = arith.constant 0 : i32
    %c4999_i32_82 = arith.constant 4999 : i32
    %94 = arith.maxsi %c0_i32_81, %93 : i32
    %95 = arith.minsi %c4999_i32_82, %94 : i32
    %c11_i32 = arith.constant 11 : i32
    %c0_i32_83 = arith.constant 0 : i32
    %96 = tpu.memref_slice %arg2[%95, %c0_i32_83] : memref<5000x128xf32, #tpu.memory_space<any>> -> memref<1x128xf32, #tpu.memory_space<any>>
    %c41_i32 = arith.constant 41 : i32
    %c0_i32_84 = arith.constant 0 : i32
    %97 = tpu.memref_slice %arg7[%c41_i32, %c0_i32_84] : memref<64x128xf32, #tpu.memory_space<vmem>> -> memref<1x128xf32, #tpu.memory_space<vmem>>
    %98 = tpu.memref_slice %arg8[%c11_i32] : memref<16x!tpu.dma_semaphore, #tpu.memory_space<semaphore_mem>> -> memref<1x!tpu.dma_semaphore, #tpu.memory_space<semaphore_mem>>
    %99 = tpu.memref_squeeze %98 : memref<1x!tpu.dma_semaphore, #tpu.memory_space<semaphore_mem>> -> memref<!tpu.dma_semaphore, #tpu.memory_space<semaphore_mem>>
    tpu.enqueue_dma source(%96 : memref<1x128xf32, #tpu.memory_space<any>>) target(%97 : memref<1x128xf32, #tpu.memory_space<vmem>>) target_semaphore(%99 : memref<!tpu.dma_semaphore, #tpu.memory_space<semaphore_mem>>)
    %c0_85 = arith.constant 0 : index
    %c6 = arith.constant 6 : index
    %100 = memref.load %arg1[%c0_85, %c6] : memref<2x8xi32, #tpu.memory_space<smem>>
    %c0_i32_86 = arith.constant 0 : i32
    %c4999_i32_87 = arith.constant 4999 : i32
    %101 = arith.maxsi %c0_i32_86, %100 : i32
    %102 = arith.minsi %c4999_i32_87, %101 : i32
    %c12_i32 = arith.constant 12 : i32
    %c0_i32_88 = arith.constant 0 : i32
    %103 = tpu.memref_slice %arg2[%102, %c0_i32_88] : memref<5000x128xf32, #tpu.memory_space<any>> -> memref<1x128xf32, #tpu.memory_space<any>>
    %c48_i32 = arith.constant 48 : i32
    %c0_i32_89 = arith.constant 0 : i32
    %104 = tpu.memref_slice %arg7[%c48_i32, %c0_i32_89] : memref<64x128xf32, #tpu.memory_space<vmem>> -> memref<1x128xf32, #tpu.memory_space<vmem>>
    %105 = tpu.memref_slice %arg8[%c12_i32] : memref<16x!tpu.dma_semaphore, #tpu.memory_space<semaphore_mem>> -> memref<1x!tpu.dma_semaphore, #tpu.memory_space<semaphore_mem>>
    %106 = tpu.memref_squeeze %105 : memref<1x!tpu.dma_semaphore, #tpu.memory_space<semaphore_mem>> -> memref<!tpu.dma_semaphore, #tpu.memory_space<semaphore_mem>>
    tpu.enqueue_dma source(%103 : memref<1x128xf32, #tpu.memory_space<any>>) target(%104 : memref<1x128xf32, #tpu.memory_space<vmem>>) target_semaphore(%106 : memref<!tpu.dma_semaphore, #tpu.memory_space<semaphore_mem>>)
    %c1_90 = arith.constant 1 : index
    %c6_91 = arith.constant 6 : index
    %107 = memref.load %arg1[%c1_90, %c6_91] : memref<2x8xi32, #tpu.memory_space<smem>>
    %c0_i32_92 = arith.constant 0 : i32
    %c4999_i32_93 = arith.constant 4999 : i32
    %108 = arith.maxsi %c0_i32_92, %107 : i32
    %109 = arith.minsi %c4999_i32_93, %108 : i32
    %c13_i32 = arith.constant 13 : i32
    %c0_i32_94 = arith.constant 0 : i32
    %110 = tpu.memref_slice %arg2[%109, %c0_i32_94] : memref<5000x128xf32, #tpu.memory_space<any>> -> memref<1x128xf32, #tpu.memory_space<any>>
    %c49_i32 = arith.constant 49 : i32
    %c0_i32_95 = arith.constant 0 : i32
    %111 = tpu.memref_slice %arg7[%c49_i32, %c0_i32_95] : memref<64x128xf32, #tpu.memory_space<vmem>> -> memref<1x128xf32, #tpu.memory_space<vmem>>
    %112 = tpu.memref_slice %arg8[%c13_i32] : memref<16x!tpu.dma_semaphore, #tpu.memory_space<semaphore_mem>> -> memref<1x!tpu.dma_semaphore, #tpu.memory_space<semaphore_mem>>
    %113 = tpu.memref_squeeze %112 : memref<1x!tpu.dma_semaphore, #tpu.memory_space<semaphore_mem>> -> memref<!tpu.dma_semaphore, #tpu.memory_space<semaphore_mem>>
    tpu.enqueue_dma source(%110 : memref<1x128xf32, #tpu.memory_space<any>>) target(%111 : memref<1x128xf32, #tpu.memory_space<vmem>>) target_semaphore(%113 : memref<!tpu.dma_semaphore, #tpu.memory_space<semaphore_mem>>)
    %c0_96 = arith.constant 0 : index
    %c7 = arith.constant 7 : index
    %114 = memref.load %arg1[%c0_96, %c7] : memref<2x8xi32, #tpu.memory_space<smem>>
    %c0_i32_97 = arith.constant 0 : i32
    %c4999_i32_98 = arith.constant 4999 : i32
    %115 = arith.maxsi %c0_i32_97, %114 : i32
    %116 = arith.minsi %c4999_i32_98, %115 : i32
    %c14_i32 = arith.constant 14 : i32
    %c0_i32_99 = arith.constant 0 : i32
    %117 = tpu.memref_slice %arg2[%116, %c0_i32_99] : memref<5000x128xf32, #tpu.memory_space<any>> -> memref<1x128xf32, #tpu.memory_space<any>>
    %c56_i32 = arith.constant 56 : i32
    %c0_i32_100 = arith.constant 0 : i32
    %118 = tpu.memref_slice %arg7[%c56_i32, %c0_i32_100] : memref<64x128xf32, #tpu.memory_space<vmem>> -> memref<1x128xf32, #tpu.memory_space<vmem>>
    %119 = tpu.memref_slice %arg8[%c14_i32] : memref<16x!tpu.dma_semaphore, #tpu.memory_space<semaphore_mem>> -> memref<1x!tpu.dma_semaphore, #tpu.memory_space<semaphore_mem>>
    %120 = tpu.memref_squeeze %119 : memref<1x!tpu.dma_semaphore, #tpu.memory_space<semaphore_mem>> -> memref<!tpu.dma_semaphore, #tpu.memory_space<semaphore_mem>>
    tpu.enqueue_dma source(%117 : memref<1x128xf32, #tpu.memory_space<any>>) target(%118 : memref<1x128xf32, #tpu.memory_space<vmem>>) target_semaphore(%120 : memref<!tpu.dma_semaphore, #tpu.memory_space<semaphore_mem>>)
    %c1_101 = arith.constant 1 : index
    %c7_102 = arith.constant 7 : index
    %121 = memref.load %arg1[%c1_101, %c7_102] : memref<2x8xi32, #tpu.memory_space<smem>>
    %c0_i32_103 = arith.constant 0 : i32
    %c4999_i32_104 = arith.constant 4999 : i32
    %122 = arith.maxsi %c0_i32_103, %121 : i32
    %123 = arith.minsi %c4999_i32_104, %122 : i32
    %c15_i32 = arith.constant 15 : i32
    %c0_i32_105 = arith.constant 0 : i32
    %124 = tpu.memref_slice %arg2[%123, %c0_i32_105] : memref<5000x128xf32, #tpu.memory_space<any>> -> memref<1x128xf32, #tpu.memory_space<any>>
    %c57_i32 = arith.constant 57 : i32
    %c0_i32_106 = arith.constant 0 : i32
    %125 = tpu.memref_slice %arg7[%c57_i32, %c0_i32_106] : memref<64x128xf32, #tpu.memory_space<vmem>> -> memref<1x128xf32, #tpu.memory_space<vmem>>
    %126 = tpu.memref_slice %arg8[%c15_i32] : memref<16x!tpu.dma_semaphore, #tpu.memory_space<semaphore_mem>> -> memref<1x!tpu.dma_semaphore, #tpu.memory_space<semaphore_mem>>
    %127 = tpu.memref_squeeze %126 : memref<1x!tpu.dma_semaphore, #tpu.memory_space<semaphore_mem>> -> memref<!tpu.dma_semaphore, #tpu.memory_space<semaphore_mem>>
    tpu.enqueue_dma source(%124 : memref<1x128xf32, #tpu.memory_space<any>>) target(%125 : memref<1x128xf32, #tpu.memory_space<vmem>>) target_semaphore(%127 : memref<!tpu.dma_semaphore, #tpu.memory_space<semaphore_mem>>)
    %c0_i32_107 = arith.constant 0 : i32
    %c0_i32_108 = arith.constant 0 : i32
    %128 = tpu.memref_slice %arg2[%18, %c0_i32_108] : memref<5000x128xf32, #tpu.memory_space<any>> -> memref<1x128xf32, #tpu.memory_space<any>>
    %c0_i32_109 = arith.constant 0 : i32
    %c0_i32_110 = arith.constant 0 : i32
    %129 = tpu.memref_slice %arg7[%c0_i32_109, %c0_i32_110] : memref<64x128xf32, #tpu.memory_space<vmem>> -> memref<1x128xf32, #tpu.memory_space<vmem>>
    %130 = tpu.memref_slice %arg8[%c0_i32_107] : memref<16x!tpu.dma_semaphore, #tpu.memory_space<semaphore_mem>> -> memref<1x!tpu.dma_semaphore, #tpu.memory_space<semaphore_mem>>
    %131 = tpu.memref_squeeze %130 : memref<1x!tpu.dma_semaphore, #tpu.memory_space<semaphore_mem>> -> memref<!tpu.dma_semaphore, #tpu.memory_space<semaphore_mem>>
    tpu.wait_dma2 semaphore(%131 : memref<!tpu.dma_semaphore, #tpu.memory_space<semaphore_mem>>) src(%128 : memref<1x128xf32, #tpu.memory_space<any>>) dst(%129 : memref<1x128xf32, #tpu.memory_space<vmem>>)
    %c1_i32_111 = arith.constant 1 : i32
    %c0_i32_112 = arith.constant 0 : i32
    %132 = tpu.memref_slice %arg2[%25, %c0_i32_112] : memref<5000x128xf32, #tpu.memory_space<any>> -> memref<1x128xf32, #tpu.memory_space<any>>
    %c1_i32_113 = arith.constant 1 : i32
    %c0_i32_114 = arith.constant 0 : i32
    %133 = tpu.memref_slice %arg7[%c1_i32_113, %c0_i32_114] : memref<64x128xf32, #tpu.memory_space<vmem>> -> memref<1x128xf32, #tpu.memory_space<vmem>>
    %134 = tpu.memref_slice %arg8[%c1_i32_111] : memref<16x!tpu.dma_semaphore, #tpu.memory_space<semaphore_mem>> -> memref<1x!tpu.dma_semaphore, #tpu.memory_space<semaphore_mem>>
    %135 = tpu.memref_squeeze %134 : memref<1x!tpu.dma_semaphore, #tpu.memory_space<semaphore_mem>> -> memref<!tpu.dma_semaphore, #tpu.memory_space<semaphore_mem>>
    tpu.wait_dma2 semaphore(%135 : memref<!tpu.dma_semaphore, #tpu.memory_space<semaphore_mem>>) src(%132 : memref<1x128xf32, #tpu.memory_space<any>>) dst(%133 : memref<1x128xf32, #tpu.memory_space<vmem>>)
    %c2_i32_115 = arith.constant 2 : i32
    %c0_i32_116 = arith.constant 0 : i32
    %136 = tpu.memref_slice %arg2[%32, %c0_i32_116] : memref<5000x128xf32, #tpu.memory_space<any>> -> memref<1x128xf32, #tpu.memory_space<any>>
    %c8_i32_117 = arith.constant 8 : i32
    %c0_i32_118 = arith.constant 0 : i32
    %137 = tpu.memref_slice %arg7[%c8_i32_117, %c0_i32_118] : memref<64x128xf32, #tpu.memory_space<vmem>> -> memref<1x128xf32, #tpu.memory_space<vmem>>
    %138 = tpu.memref_slice %arg8[%c2_i32_115] : memref<16x!tpu.dma_semaphore, #tpu.memory_space<semaphore_mem>> -> memref<1x!tpu.dma_semaphore, #tpu.memory_space<semaphore_mem>>
    %139 = tpu.memref_squeeze %138 : memref<1x!tpu.dma_semaphore, #tpu.memory_space<semaphore_mem>> -> memref<!tpu.dma_semaphore, #tpu.memory_space<semaphore_mem>>
    tpu.wait_dma2 semaphore(%139 : memref<!tpu.dma_semaphore, #tpu.memory_space<semaphore_mem>>) src(%136 : memref<1x128xf32, #tpu.memory_space<any>>) dst(%137 : memref<1x128xf32, #tpu.memory_space<vmem>>)
    %c3_i32_119 = arith.constant 3 : i32
    %c0_i32_120 = arith.constant 0 : i32
    %140 = tpu.memref_slice %arg2[%39, %c0_i32_120] : memref<5000x128xf32, #tpu.memory_space<any>> -> memref<1x128xf32, #tpu.memory_space<any>>
    %c9_i32_121 = arith.constant 9 : i32
    %c0_i32_122 = arith.constant 0 : i32
    %141 = tpu.memref_slice %arg7[%c9_i32_121, %c0_i32_122] : memref<64x128xf32, #tpu.memory_space<vmem>> -> memref<1x128xf32, #tpu.memory_space<vmem>>
    %142 = tpu.memref_slice %arg8[%c3_i32_119] : memref<16x!tpu.dma_semaphore, #tpu.memory_space<semaphore_mem>> -> memref<1x!tpu.dma_semaphore, #tpu.memory_space<semaphore_mem>>
    %143 = tpu.memref_squeeze %142 : memref<1x!tpu.dma_semaphore, #tpu.memory_space<semaphore_mem>> -> memref<!tpu.dma_semaphore, #tpu.memory_space<semaphore_mem>>
    tpu.wait_dma2 semaphore(%143 : memref<!tpu.dma_semaphore, #tpu.memory_space<semaphore_mem>>) src(%140 : memref<1x128xf32, #tpu.memory_space<any>>) dst(%141 : memref<1x128xf32, #tpu.memory_space<vmem>>)
    %c4_i32_123 = arith.constant 4 : i32
    %c0_i32_124 = arith.constant 0 : i32
    %144 = tpu.memref_slice %arg2[%46, %c0_i32_124] : memref<5000x128xf32, #tpu.memory_space<any>> -> memref<1x128xf32, #tpu.memory_space<any>>
    %c16_i32_125 = arith.constant 16 : i32
    %c0_i32_126 = arith.constant 0 : i32
    %145 = tpu.memref_slice %arg7[%c16_i32_125, %c0_i32_126] : memref<64x128xf32, #tpu.memory_space<vmem>> -> memref<1x128xf32, #tpu.memory_space<vmem>>
    %146 = tpu.memref_slice %arg8[%c4_i32_123] : memref<16x!tpu.dma_semaphore, #tpu.memory_space<semaphore_mem>> -> memref<1x!tpu.dma_semaphore, #tpu.memory_space<semaphore_mem>>
    %147 = tpu.memref_squeeze %146 : memref<1x!tpu.dma_semaphore, #tpu.memory_space<semaphore_mem>> -> memref<!tpu.dma_semaphore, #tpu.memory_space<semaphore_mem>>
    tpu.wait_dma2 semaphore(%147 : memref<!tpu.dma_semaphore, #tpu.memory_space<semaphore_mem>>) src(%144 : memref<1x128xf32, #tpu.memory_space<any>>) dst(%145 : memref<1x128xf32, #tpu.memory_space<vmem>>)
    %c5_i32_127 = arith.constant 5 : i32
    %c0_i32_128 = arith.constant 0 : i32
    %148 = tpu.memref_slice %arg2[%53, %c0_i32_128] : memref<5000x128xf32, #tpu.memory_space<any>> -> memref<1x128xf32, #tpu.memory_space<any>>
    %c17_i32_129 = arith.constant 17 : i32
    %c0_i32_130 = arith.constant 0 : i32
    %149 = tpu.memref_slice %arg7[%c17_i32_129, %c0_i32_130] : memref<64x128xf32, #tpu.memory_space<vmem>> -> memref<1x128xf32, #tpu.memory_space<vmem>>
    %150 = tpu.memref_slice %arg8[%c5_i32_127] : memref<16x!tpu.dma_semaphore, #tpu.memory_space<semaphore_mem>> -> memref<1x!tpu.dma_semaphore, #tpu.memory_space<semaphore_mem>>
    %151 = tpu.memref_squeeze %150 : memref<1x!tpu.dma_semaphore, #tpu.memory_space<semaphore_mem>> -> memref<!tpu.dma_semaphore, #tpu.memory_space<semaphore_mem>>
    tpu.wait_dma2 semaphore(%151 : memref<!tpu.dma_semaphore, #tpu.memory_space<semaphore_mem>>) src(%148 : memref<1x128xf32, #tpu.memory_space<any>>) dst(%149 : memref<1x128xf32, #tpu.memory_space<vmem>>)
    %c6_i32_131 = arith.constant 6 : i32
    %c0_i32_132 = arith.constant 0 : i32
    %152 = tpu.memref_slice %arg2[%60, %c0_i32_132] : memref<5000x128xf32, #tpu.memory_space<any>> -> memref<1x128xf32, #tpu.memory_space<any>>
    %c24_i32_133 = arith.constant 24 : i32
    %c0_i32_134 = arith.constant 0 : i32
    %153 = tpu.memref_slice %arg7[%c24_i32_133, %c0_i32_134] : memref<64x128xf32, #tpu.memory_space<vmem>> -> memref<1x128xf32, #tpu.memory_space<vmem>>
    %154 = tpu.memref_slice %arg8[%c6_i32_131] : memref<16x!tpu.dma_semaphore, #tpu.memory_space<semaphore_mem>> -> memref<1x!tpu.dma_semaphore, #tpu.memory_space<semaphore_mem>>
    %155 = tpu.memref_squeeze %154 : memref<1x!tpu.dma_semaphore, #tpu.memory_space<semaphore_mem>> -> memref<!tpu.dma_semaphore, #tpu.memory_space<semaphore_mem>>
    tpu.wait_dma2 semaphore(%155 : memref<!tpu.dma_semaphore, #tpu.memory_space<semaphore_mem>>) src(%152 : memref<1x128xf32, #tpu.memory_space<any>>) dst(%153 : memref<1x128xf32, #tpu.memory_space<vmem>>)
    %c7_i32_135 = arith.constant 7 : i32
    %c0_i32_136 = arith.constant 0 : i32
    %156 = tpu.memref_slice %arg2[%67, %c0_i32_136] : memref<5000x128xf32, #tpu.memory_space<any>> -> memref<1x128xf32, #tpu.memory_space<any>>
    %c25_i32_137 = arith.constant 25 : i32
    %c0_i32_138 = arith.constant 0 : i32
    %157 = tpu.memref_slice %arg7[%c25_i32_137, %c0_i32_138] : memref<64x128xf32, #tpu.memory_space<vmem>> -> memref<1x128xf32, #tpu.memory_space<vmem>>
    %158 = tpu.memref_slice %arg8[%c7_i32_135] : memref<16x!tpu.dma_semaphore, #tpu.memory_space<semaphore_mem>> -> memref<1x!tpu.dma_semaphore, #tpu.memory_space<semaphore_mem>>
    %159 = tpu.memref_squeeze %158 : memref<1x!tpu.dma_semaphore, #tpu.memory_space<semaphore_mem>> -> memref<!tpu.dma_semaphore, #tpu.memory_space<semaphore_mem>>
    tpu.wait_dma2 semaphore(%159 : memref<!tpu.dma_semaphore, #tpu.memory_space<semaphore_mem>>) src(%156 : memref<1x128xf32, #tpu.memory_space<any>>) dst(%157 : memref<1x128xf32, #tpu.memory_space<vmem>>)
    %c8_i32_139 = arith.constant 8 : i32
    %c0_i32_140 = arith.constant 0 : i32
    %160 = tpu.memref_slice %arg2[%74, %c0_i32_140] : memref<5000x128xf32, #tpu.memory_space<any>> -> memref<1x128xf32, #tpu.memory_space<any>>
    %c32_i32_141 = arith.constant 32 : i32
    %c0_i32_142 = arith.constant 0 : i32
    %161 = tpu.memref_slice %arg7[%c32_i32_141, %c0_i32_142] : memref<64x128xf32, #tpu.memory_space<vmem>> -> memref<1x128xf32, #tpu.memory_space<vmem>>
    %162 = tpu.memref_slice %arg8[%c8_i32_139] : memref<16x!tpu.dma_semaphore, #tpu.memory_space<semaphore_mem>> -> memref<1x!tpu.dma_semaphore, #tpu.memory_space<semaphore_mem>>
    %163 = tpu.memref_squeeze %162 : memref<1x!tpu.dma_semaphore, #tpu.memory_space<semaphore_mem>> -> memref<!tpu.dma_semaphore, #tpu.memory_space<semaphore_mem>>
    tpu.wait_dma2 semaphore(%163 : memref<!tpu.dma_semaphore, #tpu.memory_space<semaphore_mem>>) src(%160 : memref<1x128xf32, #tpu.memory_space<any>>) dst(%161 : memref<1x128xf32, #tpu.memory_space<vmem>>)
    %c9_i32_143 = arith.constant 9 : i32
    %c0_i32_144 = arith.constant 0 : i32
    %164 = tpu.memref_slice %arg2[%81, %c0_i32_144] : memref<5000x128xf32, #tpu.memory_space<any>> -> memref<1x128xf32, #tpu.memory_space<any>>
    %c33_i32_145 = arith.constant 33 : i32
    %c0_i32_146 = arith.constant 0 : i32
    %165 = tpu.memref_slice %arg7[%c33_i32_145, %c0_i32_146] : memref<64x128xf32, #tpu.memory_space<vmem>> -> memref<1x128xf32, #tpu.memory_space<vmem>>
    %166 = tpu.memref_slice %arg8[%c9_i32_143] : memref<16x!tpu.dma_semaphore, #tpu.memory_space<semaphore_mem>> -> memref<1x!tpu.dma_semaphore, #tpu.memory_space<semaphore_mem>>
    %167 = tpu.memref_squeeze %166 : memref<1x!tpu.dma_semaphore, #tpu.memory_space<semaphore_mem>> -> memref<!tpu.dma_semaphore, #tpu.memory_space<semaphore_mem>>
    tpu.wait_dma2 semaphore(%167 : memref<!tpu.dma_semaphore, #tpu.memory_space<semaphore_mem>>) src(%164 : memref<1x128xf32, #tpu.memory_space<any>>) dst(%165 : memref<1x128xf32, #tpu.memory_space<vmem>>)
    %c10_i32_147 = arith.constant 10 : i32
    %c0_i32_148 = arith.constant 0 : i32
    %168 = tpu.memref_slice %arg2[%88, %c0_i32_148] : memref<5000x128xf32, #tpu.memory_space<any>> -> memref<1x128xf32, #tpu.memory_space<any>>
    %c40_i32_149 = arith.constant 40 : i32
    %c0_i32_150 = arith.constant 0 : i32
    %169 = tpu.memref_slice %arg7[%c40_i32_149, %c0_i32_150] : memref<64x128xf32, #tpu.memory_space<vmem>> -> memref<1x128xf32, #tpu.memory_space<vmem>>
    %170 = tpu.memref_slice %arg8[%c10_i32_147] : memref<16x!tpu.dma_semaphore, #tpu.memory_space<semaphore_mem>> -> memref<1x!tpu.dma_semaphore, #tpu.memory_space<semaphore_mem>>
    %171 = tpu.memref_squeeze %170 : memref<1x!tpu.dma_semaphore, #tpu.memory_space<semaphore_mem>> -> memref<!tpu.dma_semaphore, #tpu.memory_space<semaphore_mem>>
    tpu.wait_dma2 semaphore(%171 : memref<!tpu.dma_semaphore, #tpu.memory_space<semaphore_mem>>) src(%168 : memref<1x128xf32, #tpu.memory_space<any>>) dst(%169 : memref<1x128xf32, #tpu.memory_space<vmem>>)
    %c11_i32_151 = arith.constant 11 : i32
    %c0_i32_152 = arith.constant 0 : i32
    %172 = tpu.memref_slice %arg2[%95, %c0_i32_152] : memref<5000x128xf32, #tpu.memory_space<any>> -> memref<1x128xf32, #tpu.memory_space<any>>
    %c41_i32_153 = arith.constant 41 : i32
    %c0_i32_154 = arith.constant 0 : i32
    %173 = tpu.memref_slice %arg7[%c41_i32_153, %c0_i32_154] : memref<64x128xf32, #tpu.memory_space<vmem>> -> memref<1x128xf32, #tpu.memory_space<vmem>>
    %174 = tpu.memref_slice %arg8[%c11_i32_151] : memref<16x!tpu.dma_semaphore, #tpu.memory_space<semaphore_mem>> -> memref<1x!tpu.dma_semaphore, #tpu.memory_space<semaphore_mem>>
    %175 = tpu.memref_squeeze %174 : memref<1x!tpu.dma_semaphore, #tpu.memory_space<semaphore_mem>> -> memref<!tpu.dma_semaphore, #tpu.memory_space<semaphore_mem>>
    tpu.wait_dma2 semaphore(%175 : memref<!tpu.dma_semaphore, #tpu.memory_space<semaphore_mem>>) src(%172 : memref<1x128xf32, #tpu.memory_space<any>>) dst(%173 : memref<1x128xf32, #tpu.memory_space<vmem>>)
    %c12_i32_155 = arith.constant 12 : i32
    %c0_i32_156 = arith.constant 0 : i32
    %176 = tpu.memref_slice %arg2[%102, %c0_i32_156] : memref<5000x128xf32, #tpu.memory_space<any>> -> memref<1x128xf32, #tpu.memory_space<any>>
    %c48_i32_157 = arith.constant 48 : i32
    %c0_i32_158 = arith.constant 0 : i32
    %177 = tpu.memref_slice %arg7[%c48_i32_157, %c0_i32_158] : memref<64x128xf32, #tpu.memory_space<vmem>> -> memref<1x128xf32, #tpu.memory_space<vmem>>
    %178 = tpu.memref_slice %arg8[%c12_i32_155] : memref<16x!tpu.dma_semaphore, #tpu.memory_space<semaphore_mem>> -> memref<1x!tpu.dma_semaphore, #tpu.memory_space<semaphore_mem>>
    %179 = tpu.memref_squeeze %178 : memref<1x!tpu.dma_semaphore, #tpu.memory_space<semaphore_mem>> -> memref<!tpu.dma_semaphore, #tpu.memory_space<semaphore_mem>>
    tpu.wait_dma2 semaphore(%179 : memref<!tpu.dma_semaphore, #tpu.memory_space<semaphore_mem>>) src(%176 : memref<1x128xf32, #tpu.memory_space<any>>) dst(%177 : memref<1x128xf32, #tpu.memory_space<vmem>>)
    %c13_i32_159 = arith.constant 13 : i32
    %c0_i32_160 = arith.constant 0 : i32
    %180 = tpu.memref_slice %arg2[%109, %c0_i32_160] : memref<5000x128xf32, #tpu.memory_space<any>> -> memref<1x128xf32, #tpu.memory_space<any>>
    %c49_i32_161 = arith.constant 49 : i32
    %c0_i32_162 = arith.constant 0 : i32
    %181 = tpu.memref_slice %arg7[%c49_i32_161, %c0_i32_162] : memref<64x128xf32, #tpu.memory_space<vmem>> -> memref<1x128xf32, #tpu.memory_space<vmem>>
    %182 = tpu.memref_slice %arg8[%c13_i32_159] : memref<16x!tpu.dma_semaphore, #tpu.memory_space<semaphore_mem>> -> memref<1x!tpu.dma_semaphore, #tpu.memory_space<semaphore_mem>>
    %183 = tpu.memref_squeeze %182 : memref<1x!tpu.dma_semaphore, #tpu.memory_space<semaphore_mem>> -> memref<!tpu.dma_semaphore, #tpu.memory_space<semaphore_mem>>
    tpu.wait_dma2 semaphore(%183 : memref<!tpu.dma_semaphore, #tpu.memory_space<semaphore_mem>>) src(%180 : memref<1x128xf32, #tpu.memory_space<any>>) dst(%181 : memref<1x128xf32, #tpu.memory_space<vmem>>)
    %c14_i32_163 = arith.constant 14 : i32
    %c0_i32_164 = arith.constant 0 : i32
    %184 = tpu.memref_slice %arg2[%116, %c0_i32_164] : memref<5000x128xf32, #tpu.memory_space<any>> -> memref<1x128xf32, #tpu.memory_space<any>>
    %c56_i32_165 = arith.constant 56 : i32
    %c0_i32_166 = arith.constant 0 : i32
    %185 = tpu.memref_slice %arg7[%c56_i32_165, %c0_i32_166] : memref<64x128xf32, #tpu.memory_space<vmem>> -> memref<1x128xf32, #tpu.memory_space<vmem>>
    %186 = tpu.memref_slice %arg8[%c14_i32_163] : memref<16x!tpu.dma_semaphore, #tpu.memory_space<semaphore_mem>> -> memref<1x!tpu.dma_semaphore, #tpu.memory_space<semaphore_mem>>
    %187 = tpu.memref_squeeze %186 : memref<1x!tpu.dma_semaphore, #tpu.memory_space<semaphore_mem>> -> memref<!tpu.dma_semaphore, #tpu.memory_space<semaphore_mem>>
    tpu.wait_dma2 semaphore(%187 : memref<!tpu.dma_semaphore, #tpu.memory_space<semaphore_mem>>) src(%184 : memref<1x128xf32, #tpu.memory_space<any>>) dst(%185 : memref<1x128xf32, #tpu.memory_space<vmem>>)
    %c15_i32_167 = arith.constant 15 : i32
    %c0_i32_168 = arith.constant 0 : i32
    %188 = tpu.memref_slice %arg2[%123, %c0_i32_168] : memref<5000x128xf32, #tpu.memory_space<any>> -> memref<1x128xf32, #tpu.memory_space<any>>
    %c57_i32_169 = arith.constant 57 : i32
    %c0_i32_170 = arith.constant 0 : i32
    %189 = tpu.memref_slice %arg7[%c57_i32_169, %c0_i32_170] : memref<64x128xf32, #tpu.memory_space<vmem>> -> memref<1x128xf32, #tpu.memory_space<vmem>>
    %190 = tpu.memref_slice %arg8[%c15_i32_167] : memref<16x!tpu.dma_semaphore, #tpu.memory_space<semaphore_mem>> -> memref<1x!tpu.dma_semaphore, #tpu.memory_space<semaphore_mem>>
    %191 = tpu.memref_squeeze %190 : memref<1x!tpu.dma_semaphore, #tpu.memory_space<semaphore_mem>> -> memref<!tpu.dma_semaphore, #tpu.memory_space<semaphore_mem>>
    tpu.wait_dma2 semaphore(%191 : memref<!tpu.dma_semaphore, #tpu.memory_space<semaphore_mem>>) src(%188 : memref<1x128xf32, #tpu.memory_space<any>>) dst(%189 : memref<1x128xf32, #tpu.memory_space<vmem>>)
    %c0_171 = arith.constant 0 : index
    %c0_172 = arith.constant 0 : index
    %192 = vector.load %arg7[%c0_171, %c0_172] : memref<64x128xf32, #tpu.memory_space<vmem>>, vector<8x128xf32>
    %193 = vector.extract_strided_slice %192 {offsets = [0, 0], sizes = [8, 32], strides = [1, 1]} : vector<8x128xf32> to vector<8x32xf32>
    %cst_173 = arith.constant 5.000000e-01 : f32
    %194 = vector.broadcast %cst_173 : f32 to vector<8x32xf32>
    %195 = arith.mulf %194, %193 : vector<8x32xf32>
    %196 = math.tanh %195 : vector<8x32xf32>
    %cst_174 = arith.constant 1.000000e+00 : f32
    %197 = vector.broadcast %cst_174 : f32 to vector<8x32xf32>
    %198 = arith.addf %196, %197 : vector<8x32xf32>
    %cst_175 = arith.constant 5.000000e-01 : f32
    %199 = vector.broadcast %cst_175 : f32 to vector<8x32xf32>
    %200 = arith.mulf %199, %198 : vector<8x32xf32>
    %201 = vector.extract_strided_slice %192 {offsets = [0, 64], sizes = [8, 32], strides = [1, 1]} : vector<8x128xf32> to vector<8x32xf32>
    %202 = math.tanh %201 : vector<8x32xf32>
    %203 = vector.extract_strided_slice %192 {offsets = [0, 96], sizes = [8, 32], strides = [1, 1]} : vector<8x128xf32> to vector<8x32xf32>
    %cst_176 = arith.constant 5.000000e-01 : f32
    %204 = vector.broadcast %cst_176 : f32 to vector<8x32xf32>
    %205 = arith.mulf %204, %203 : vector<8x32xf32>
    %206 = math.tanh %205 : vector<8x32xf32>
    %cst_177 = arith.constant 1.000000e+00 : f32
    %207 = vector.broadcast %cst_177 : f32 to vector<8x32xf32>
    %208 = arith.addf %206, %207 : vector<8x32xf32>
    %cst_178 = arith.constant 5.000000e-01 : f32
    %209 = vector.broadcast %cst_178 : f32 to vector<8x32xf32>
    %210 = arith.mulf %209, %208 : vector<8x32xf32>
    %211 = arith.mulf %200, %202 : vector<8x32xf32>
    %212 = math.tanh %211 : vector<8x32xf32>
    %213 = arith.mulf %210, %212 : vector<8x32xf32>
    %c8 = arith.constant 8 : index
    %c0_179 = arith.constant 0 : index
    %214 = vector.load %arg7[%c8, %c0_179] : memref<64x128xf32, #tpu.memory_space<vmem>>, vector<8x128xf32>
    %c0_180 = arith.constant 0 : index
    %c0_181 = arith.constant 0 : index
    %215 = vector.load %arg3[%c0_180, %c0_181] : memref<32x128xf32, #tpu.memory_space<vmem>>, vector<32x128xf32>
    %cst_182 = arith.constant dense<0.000000e+00> : vector<8x128xf32>
    %216 = tpu.matmul %213, %215, %cst_182 {dimension_numbers = #tpu.dot_dimension_numbers<[1], [0], [0], [1], [0, 0, 1, 1], [], []>} : vector<8x32xf32>, vector<32x128xf32>, vector<8x128xf32> -> vector<8x128xf32>
    %217 = arith.addf %214, %216 : vector<8x128xf32>
    %218 = vector.extract_strided_slice %217 {offsets = [0, 0], sizes = [8, 32], strides = [1, 1]} : vector<8x128xf32> to vector<8x32xf32>
    %cst_183 = arith.constant 5.000000e-01 : f32
    %219 = vector.broadcast %cst_183 : f32 to vector<8x32xf32>
    %220 = arith.mulf %219, %218 : vector<8x32xf32>
    %221 = math.tanh %220 : vector<8x32xf32>
    %cst_184 = arith.constant 1.000000e+00 : f32
    %222 = vector.broadcast %cst_184 : f32 to vector<8x32xf32>
    %223 = arith.addf %221, %222 : vector<8x32xf32>
    %cst_185 = arith.constant 5.000000e-01 : f32
    %224 = vector.broadcast %cst_185 : f32 to vector<8x32xf32>
    %225 = arith.mulf %224, %223 : vector<8x32xf32>
    %226 = vector.extract_strided_slice %217 {offsets = [0, 64], sizes = [8, 32], strides = [1, 1]} : vector<8x128xf32> to vector<8x32xf32>
    %227 = math.tanh %226 : vector<8x32xf32>
    %228 = vector.extract_strided_slice %217 {offsets = [0, 96], sizes = [8, 32], strides = [1, 1]} : vector<8x128xf32> to vector<8x32xf32>
    %cst_186 = arith.constant 5.000000e-01 : f32
    %229 = vector.broadcast %cst_186 : f32 to vector<8x32xf32>
    %230 = arith.mulf %229, %228 : vector<8x32xf32>
    %231 = math.tanh %230 : vector<8x32xf32>
    %cst_187 = arith.constant 1.000000e+00 : f32
    %232 = vector.broadcast %cst_187 : f32 to vector<8x32xf32>
    %233 = arith.addf %231, %232 : vector<8x32xf32>
    %cst_188 = arith.constant 5.000000e-01 : f32
    %234 = vector.broadcast %cst_188 : f32 to vector<8x32xf32>
    %235 = arith.mulf %234, %233 : vector<8x32xf32>
    %236 = vector.extract_strided_slice %217 {offsets = [0, 32], sizes = [8, 32], strides = [1, 1]} : vector<8x128xf32> to vector<8x32xf32>
    %cst_189 = arith.constant 5.000000e-01 : f32
    %237 = vector.broadcast %cst_189 : f32 to vector<8x32xf32>
    %238 = arith.mulf %237, %236 : vector<8x32xf32>
    %239 = math.tanh %238 : vector<8x32xf32>
    %cst_190 = arith.constant 1.000000e+00 : f32
    %240 = vector.broadcast %cst_190 : f32 to vector<8x32xf32>
    %241 = arith.addf %239, %240 : vector<8x32xf32>
    %cst_191 = arith.constant 5.000000e-01 : f32
    %242 = vector.broadcast %cst_191 : f32 to vector<8x32xf32>
    %243 = arith.mulf %242, %241 : vector<8x32xf32>
    %244 = arith.mulf %243, %211 : vector<8x32xf32>
    %245 = arith.mulf %225, %227 : vector<8x32xf32>
    %246 = arith.addf %244, %245 : vector<8x32xf32>
    %247 = math.tanh %246 : vector<8x32xf32>
    %248 = arith.mulf %235, %247 : vector<8x32xf32>
    %c16 = arith.constant 16 : index
    %c0_192 = arith.constant 0 : index
    %249 = vector.load %arg7[%c16, %c0_192] : memref<64x128xf32, #tpu.memory_space<vmem>>, vector<8x128xf32>
    %c0_193 = arith.constant 0 : index
    %c0_194 = arith.constant 0 : index
    %250 = vector.load %arg3[%c0_193, %c0_194] : memref<32x128xf32, #tpu.memory_space<vmem>>, vector<32x128xf32>
    %cst_195 = arith.constant dense<0.000000e+00> : vector<8x128xf32>
    %251 = tpu.matmul %248, %250, %cst_195 {dimension_numbers = #tpu.dot_dimension_numbers<[1], [0], [0], [1], [0, 0, 1, 1], [], []>} : vector<8x32xf32>, vector<32x128xf32>, vector<8x128xf32> -> vector<8x128xf32>
    %252 = arith.addf %249, %251 : vector<8x128xf32>
    %253 = vector.extract_strided_slice %252 {offsets = [0, 0], sizes = [8, 32], strides = [1, 1]} : vector<8x128xf32> to vector<8x32xf32>
    %cst_196 = arith.constant 5.000000e-01 : f32
    %254 = vector.broadcast %cst_196 : f32 to vector<8x32xf32>
    %255 = arith.mulf %254, %253 : vector<8x32xf32>
    %256 = math.tanh %255 : vector<8x32xf32>
    %cst_197 = arith.constant 1.000000e+00 : f32
    %257 = vector.broadcast %cst_197 : f32 to vector<8x32xf32>
    %258 = arith.addf %256, %257 : vector<8x32xf32>
    %cst_198 = arith.constant 5.000000e-01 : f32
    %259 = vector.broadcast %cst_198 : f32 to vector<8x32xf32>
    %260 = arith.mulf %259, %258 : vector<8x32xf32>
    %261 = vector.extract_strided_slice %252 {offsets = [0, 64], sizes = [8, 32], strides = [1, 1]} : vector<8x128xf32> to vector<8x32xf32>
    %262 = math.tanh %261 : vector<8x32xf32>
    %263 = vector.extract_strided_slice %252 {offsets = [0, 96], sizes = [8, 32], strides = [1, 1]} : vector<8x128xf32> to vector<8x32xf32>
    %cst_199 = arith.constant 5.000000e-01 : f32
    %264 = vector.broadcast %cst_199 : f32 to vector<8x32xf32>
    %265 = arith.mulf %264, %263 : vector<8x32xf32>
    %266 = math.tanh %265 : vector<8x32xf32>
    %cst_200 = arith.constant 1.000000e+00 : f32
    %267 = vector.broadcast %cst_200 : f32 to vector<8x32xf32>
    %268 = arith.addf %266, %267 : vector<8x32xf32>
    %cst_201 = arith.constant 5.000000e-01 : f32
    %269 = vector.broadcast %cst_201 : f32 to vector<8x32xf32>
    %270 = arith.mulf %269, %268 : vector<8x32xf32>
    %271 = vector.extract_strided_slice %252 {offsets = [0, 32], sizes = [8, 32], strides = [1, 1]} : vector<8x128xf32> to vector<8x32xf32>
    %cst_202 = arith.constant 5.000000e-01 : f32
    %272 = vector.broadcast %cst_202 : f32 to vector<8x32xf32>
    %273 = arith.mulf %272, %271 : vector<8x32xf32>
    %274 = math.tanh %273 : vector<8x32xf32>
    %cst_203 = arith.constant 1.000000e+00 : f32
    %275 = vector.broadcast %cst_203 : f32 to vector<8x32xf32>
    %276 = arith.addf %274, %275 : vector<8x32xf32>
    %cst_204 = arith.constant 5.000000e-01 : f32
    %277 = vector.broadcast %cst_204 : f32 to vector<8x32xf32>
    %278 = arith.mulf %277, %276 : vector<8x32xf32>
    %279 = arith.mulf %278, %246 : vector<8x32xf32>
    %280 = arith.mulf %260, %262 : vector<8x32xf32>
    %281 = arith.addf %279, %280 : vector<8x32xf32>
    %282 = math.tanh %281 : vector<8x32xf32>
    %283 = arith.mulf %270, %282 : vector<8x32xf32>
    %c24 = arith.constant 24 : index
    %c0_205 = arith.constant 0 : index
    %284 = vector.load %arg7[%c24, %c0_205] : memref<64x128xf32, #tpu.memory_space<vmem>>, vector<8x128xf32>
    %c0_206 = arith.constant 0 : index
    %c0_207 = arith.constant 0 : index
    %285 = vector.load %arg3[%c0_206, %c0_207] : memref<32x128xf32, #tpu.memory_space<vmem>>, vector<32x128xf32>
    %cst_208 = arith.constant dense<0.000000e+00> : vector<8x128xf32>
    %286 = tpu.matmul %283, %285, %cst_208 {dimension_numbers = #tpu.dot_dimension_numbers<[1], [0], [0], [1], [0, 0, 1, 1], [], []>} : vector<8x32xf32>, vector<32x128xf32>, vector<8x128xf32> -> vector<8x128xf32>
    %287 = arith.addf %284, %286 : vector<8x128xf32>
    %288 = vector.extract_strided_slice %287 {offsets = [0, 0], sizes = [8, 32], strides = [1, 1]} : vector<8x128xf32> to vector<8x32xf32>
    %cst_209 = arith.constant 5.000000e-01 : f32
    %289 = vector.broadcast %cst_209 : f32 to vector<8x32xf32>
    %290 = arith.mulf %289, %288 : vector<8x32xf32>
    %291 = math.tanh %290 : vector<8x32xf32>
    %cst_210 = arith.constant 1.000000e+00 : f32
    %292 = vector.broadcast %cst_210 : f32 to vector<8x32xf32>
    %293 = arith.addf %291, %292 : vector<8x32xf32>
    %cst_211 = arith.constant 5.000000e-01 : f32
    %294 = vector.broadcast %cst_211 : f32 to vector<8x32xf32>
    %295 = arith.mulf %294, %293 : vector<8x32xf32>
    %296 = vector.extract_strided_slice %287 {offsets = [0, 64], sizes = [8, 32], strides = [1, 1]} : vector<8x128xf32> to vector<8x32xf32>
    %297 = math.tanh %296 : vector<8x32xf32>
    %298 = vector.extract_strided_slice %287 {offsets = [0, 96], sizes = [8, 32], strides = [1, 1]} : vector<8x128xf32> to vector<8x32xf32>
    %cst_212 = arith.constant 5.000000e-01 : f32
    %299 = vector.broadcast %cst_212 : f32 to vector<8x32xf32>
    %300 = arith.mulf %299, %298 : vector<8x32xf32>
    %301 = math.tanh %300 : vector<8x32xf32>
    %cst_213 = arith.constant 1.000000e+00 : f32
    %302 = vector.broadcast %cst_213 : f32 to vector<8x32xf32>
    %303 = arith.addf %301, %302 : vector<8x32xf32>
    %cst_214 = arith.constant 5.000000e-01 : f32
    %304 = vector.broadcast %cst_214 : f32 to vector<8x32xf32>
    %305 = arith.mulf %304, %303 : vector<8x32xf32>
    %306 = vector.extract_strided_slice %287 {offsets = [0, 32], sizes = [8, 32], strides = [1, 1]} : vector<8x128xf32> to vector<8x32xf32>
    %cst_215 = arith.constant 5.000000e-01 : f32
    %307 = vector.broadcast %cst_215 : f32 to vector<8x32xf32>
    %308 = arith.mulf %307, %306 : vector<8x32xf32>
    %309 = math.tanh %308 : vector<8x32xf32>
    %cst_216 = arith.constant 1.000000e+00 : f32
    %310 = vector.broadcast %cst_216 : f32 to vector<8x32xf32>
    %311 = arith.addf %309, %310 : vector<8x32xf32>
    %cst_217 = arith.constant 5.000000e-01 : f32
    %312 = vector.broadcast %cst_217 : f32 to vector<8x32xf32>
    %313 = arith.mulf %312, %311 : vector<8x32xf32>
    %314 = arith.mulf %313, %281 : vector<8x32xf32>
    %315 = arith.mulf %295, %297 : vector<8x32xf32>
    %316 = arith.addf %314, %315 : vector<8x32xf32>
    %317 = math.tanh %316 : vector<8x32xf32>
    %318 = arith.mulf %305, %317 : vector<8x32xf32>
    %c32 = arith.constant 32 : index
    %c0_218 = arith.constant 0 : index
    %319 = vector.load %arg7[%c32, %c0_218] : memref<64x128xf32, #tpu.memory_space<vmem>>, vector<8x128xf32>
    %c0_219 = arith.constant 0 : index
    %c0_220 = arith.constant 0 : index
    %320 = vector.load %arg3[%c0_219, %c0_220] : memref<32x128xf32, #tpu.memory_space<vmem>>, vector<32x128xf32>
    %cst_221 = arith.constant dense<0.000000e+00> : vector<8x128xf32>
    %321 = tpu.matmul %318, %320, %cst_221 {dimension_numbers = #tpu.dot_dimension_numbers<[1], [0], [0], [1], [0, 0, 1, 1], [], []>} : vector<8x32xf32>, vector<32x128xf32>, vector<8x128xf32> -> vector<8x128xf32>
    %322 = arith.addf %319, %321 : vector<8x128xf32>
    %323 = vector.extract_strided_slice %322 {offsets = [0, 0], sizes = [8, 32], strides = [1, 1]} : vector<8x128xf32> to vector<8x32xf32>
    %cst_222 = arith.constant 5.000000e-01 : f32
    %324 = vector.broadcast %cst_222 : f32 to vector<8x32xf32>
    %325 = arith.mulf %324, %323 : vector<8x32xf32>
    %326 = math.tanh %325 : vector<8x32xf32>
    %cst_223 = arith.constant 1.000000e+00 : f32
    %327 = vector.broadcast %cst_223 : f32 to vector<8x32xf32>
    %328 = arith.addf %326, %327 : vector<8x32xf32>
    %cst_224 = arith.constant 5.000000e-01 : f32
    %329 = vector.broadcast %cst_224 : f32 to vector<8x32xf32>
    %330 = arith.mulf %329, %328 : vector<8x32xf32>
    %331 = vector.extract_strided_slice %322 {offsets = [0, 64], sizes = [8, 32], strides = [1, 1]} : vector<8x128xf32> to vector<8x32xf32>
    %332 = math.tanh %331 : vector<8x32xf32>
    %333 = vector.extract_strided_slice %322 {offsets = [0, 96], sizes = [8, 32], strides = [1, 1]} : vector<8x128xf32> to vector<8x32xf32>
    %cst_225 = arith.constant 5.000000e-01 : f32
    %334 = vector.broadcast %cst_225 : f32 to vector<8x32xf32>
    %335 = arith.mulf %334, %333 : vector<8x32xf32>
    %336 = math.tanh %335 : vector<8x32xf32>
    %cst_226 = arith.constant 1.000000e+00 : f32
    %337 = vector.broadcast %cst_226 : f32 to vector<8x32xf32>
    %338 = arith.addf %336, %337 : vector<8x32xf32>
    %cst_227 = arith.constant 5.000000e-01 : f32
    %339 = vector.broadcast %cst_227 : f32 to vector<8x32xf32>
    %340 = arith.mulf %339, %338 : vector<8x32xf32>
    %341 = vector.extract_strided_slice %322 {offsets = [0, 32], sizes = [8, 32], strides = [1, 1]} : vector<8x128xf32> to vector<8x32xf32>
    %cst_228 = arith.constant 5.000000e-01 : f32
    %342 = vector.broadcast %cst_228 : f32 to vector<8x32xf32>
    %343 = arith.mulf %342, %341 : vector<8x32xf32>
    %344 = math.tanh %343 : vector<8x32xf32>
    %cst_229 = arith.constant 1.000000e+00 : f32
    %345 = vector.broadcast %cst_229 : f32 to vector<8x32xf32>
    %346 = arith.addf %344, %345 : vector<8x32xf32>
    %cst_230 = arith.constant 5.000000e-01 : f32
    %347 = vector.broadcast %cst_230 : f32 to vector<8x32xf32>
    %348 = arith.mulf %347, %346 : vector<8x32xf32>
    %349 = arith.mulf %348, %316 : vector<8x32xf32>
    %350 = arith.mulf %330, %332 : vector<8x32xf32>
    %351 = arith.addf %349, %350 : vector<8x32xf32>
    %352 = math.tanh %351 : vector<8x32xf32>
    %353 = arith.mulf %340, %352 : vector<8x32xf32>
    %c40 = arith.constant 40 : index
    %c0_231 = arith.constant 0 : index
    %354 = vector.load %arg7[%c40, %c0_231] : memref<64x128xf32, #tpu.memory_space<vmem>>, vector<8x128xf32>
    %c0_232 = arith.constant 0 : index
    %c0_233 = arith.constant 0 : index
    %355 = vector.load %arg3[%c0_232, %c0_233] : memref<32x128xf32, #tpu.memory_space<vmem>>, vector<32x128xf32>
    %cst_234 = arith.constant dense<0.000000e+00> : vector<8x128xf32>
    %356 = tpu.matmul %353, %355, %cst_234 {dimension_numbers = #tpu.dot_dimension_numbers<[1], [0], [0], [1], [0, 0, 1, 1], [], []>} : vector<8x32xf32>, vector<32x128xf32>, vector<8x128xf32> -> vector<8x128xf32>
    %357 = arith.addf %354, %356 : vector<8x128xf32>
    %358 = vector.extract_strided_slice %357 {offsets = [0, 0], sizes = [8, 32], strides = [1, 1]} : vector<8x128xf32> to vector<8x32xf32>
    %cst_235 = arith.constant 5.000000e-01 : f32
    %359 = vector.broadcast %cst_235 : f32 to vector<8x32xf32>
    %360 = arith.mulf %359, %358 : vector<8x32xf32>
    %361 = math.tanh %360 : vector<8x32xf32>
    %cst_236 = arith.constant 1.000000e+00 : f32
    %362 = vector.broadcast %cst_236 : f32 to vector<8x32xf32>
    %363 = arith.addf %361, %362 : vector<8x32xf32>
    %cst_237 = arith.constant 5.000000e-01 : f32
    %364 = vector.broadcast %cst_237 : f32 to vector<8x32xf32>
    %365 = arith.mulf %364, %363 : vector<8x32xf32>
    %366 = vector.extract_strided_slice %357 {offsets = [0, 64], sizes = [8, 32], strides = [1, 1]} : vector<8x128xf32> to vector<8x32xf32>
    %367 = math.tanh %366 : vector<8x32xf32>
    %368 = vector.extract_strided_slice %357 {offsets = [0, 96], sizes = [8, 32], strides = [1, 1]} : vector<8x128xf32> to vector<8x32xf32>
    %cst_238 = arith.constant 5.000000e-01 : f32
    %369 = vector.broadcast %cst_238 : f32 to vector<8x32xf32>
    %370 = arith.mulf %369, %368 : vector<8x32xf32>
    %371 = math.tanh %370 : vector<8x32xf32>
    %cst_239 = arith.constant 1.000000e+00 : f32
    %372 = vector.broadcast %cst_239 : f32 to vector<8x32xf32>
    %373 = arith.addf %371, %372 : vector<8x32xf32>
    %cst_240 = arith.constant 5.000000e-01 : f32
    %374 = vector.broadcast %cst_240 : f32 to vector<8x32xf32>
    %375 = arith.mulf %374, %373 : vector<8x32xf32>
    %376 = vector.extract_strided_slice %357 {offsets = [0, 32], sizes = [8, 32], strides = [1, 1]} : vector<8x128xf32> to vector<8x32xf32>
    %cst_241 = arith.constant 5.000000e-01 : f32
    %377 = vector.broadcast %cst_241 : f32 to vector<8x32xf32>
    %378 = arith.mulf %377, %376 : vector<8x32xf32>
    %379 = math.tanh %378 : vector<8x32xf32>
    %cst_242 = arith.constant 1.000000e+00 : f32
    %380 = vector.broadcast %cst_242 : f32 to vector<8x32xf32>
    %381 = arith.addf %379, %380 : vector<8x32xf32>
    %cst_243 = arith.constant 5.000000e-01 : f32
    %382 = vector.broadcast %cst_243 : f32 to vector<8x32xf32>
    %383 = arith.mulf %382, %381 : vector<8x32xf32>
    %384 = arith.mulf %383, %351 : vector<8x32xf32>
    %385 = arith.mulf %365, %367 : vector<8x32xf32>
    %386 = arith.addf %384, %385 : vector<8x32xf32>
    %387 = math.tanh %386 : vector<8x32xf32>
    %388 = arith.mulf %375, %387 : vector<8x32xf32>
    %c48 = arith.constant 48 : index
    %c0_244 = arith.constant 0 : index
    %389 = vector.load %arg7[%c48, %c0_244] : memref<64x128xf32, #tpu.memory_space<vmem>>, vector<8x128xf32>
    %c0_245 = arith.constant 0 : index
    %c0_246 = arith.constant 0 : index
    %390 = vector.load %arg3[%c0_245, %c0_246] : memref<32x128xf32, #tpu.memory_space<vmem>>, vector<32x128xf32>
    %cst_247 = arith.constant dense<0.000000e+00> : vector<8x128xf32>
    %391 = tpu.matmul %388, %390, %cst_247 {dimension_numbers = #tpu.dot_dimension_numbers<[1], [0], [0], [1], [0, 0, 1, 1], [], []>} : vector<8x32xf32>, vector<32x128xf32>, vector<8x128xf32> -> vector<8x128xf32>
    %392 = arith.addf %389, %391 : vector<8x128xf32>
    %393 = vector.extract_strided_slice %392 {offsets = [0, 0], sizes = [8, 32], strides = [1, 1]} : vector<8x128xf32> to vector<8x32xf32>
    %cst_248 = arith.constant 5.000000e-01 : f32
    %394 = vector.broadcast %cst_248 : f32 to vector<8x32xf32>
    %395 = arith.mulf %394, %393 : vector<8x32xf32>
    %396 = math.tanh %395 : vector<8x32xf32>
    %cst_249 = arith.constant 1.000000e+00 : f32
    %397 = vector.broadcast %cst_249 : f32 to vector<8x32xf32>
    %398 = arith.addf %396, %397 : vector<8x32xf32>
    %cst_250 = arith.constant 5.000000e-01 : f32
    %399 = vector.broadcast %cst_250 : f32 to vector<8x32xf32>
    %400 = arith.mulf %399, %398 : vector<8x32xf32>
    %401 = vector.extract_strided_slice %392 {offsets = [0, 64], sizes = [8, 32], strides = [1, 1]} : vector<8x128xf32> to vector<8x32xf32>
    %402 = math.tanh %401 : vector<8x32xf32>
    %403 = vector.extract_strided_slice %392 {offsets = [0, 96], sizes = [8, 32], strides = [1, 1]} : vector<8x128xf32> to vector<8x32xf32>
    %cst_251 = arith.constant 5.000000e-01 : f32
    %404 = vector.broadcast %cst_251 : f32 to vector<8x32xf32>
    %405 = arith.mulf %404, %403 : vector<8x32xf32>
    %406 = math.tanh %405 : vector<8x32xf32>
    %cst_252 = arith.constant 1.000000e+00 : f32
    %407 = vector.broadcast %cst_252 : f32 to vector<8x32xf32>
    %408 = arith.addf %406, %407 : vector<8x32xf32>
    %cst_253 = arith.constant 5.000000e-01 : f32
    %409 = vector.broadcast %cst_253 : f32 to vector<8x32xf32>
    %410 = arith.mulf %409, %408 : vector<8x32xf32>
    %411 = vector.extract_strided_slice %392 {offsets = [0, 32], sizes = [8, 32], strides = [1, 1]} : vector<8x128xf32> to vector<8x32xf32>
    %cst_254 = arith.constant 5.000000e-01 : f32
    %412 = vector.broadcast %cst_254 : f32 to vector<8x32xf32>
    %413 = arith.mulf %412, %411 : vector<8x32xf32>
    %414 = math.tanh %413 : vector<8x32xf32>
    %cst_255 = arith.constant 1.000000e+00 : f32
    %415 = vector.broadcast %cst_255 : f32 to vector<8x32xf32>
    %416 = arith.addf %414, %415 : vector<8x32xf32>
    %cst_256 = arith.constant 5.000000e-01 : f32
    %417 = vector.broadcast %cst_256 : f32 to vector<8x32xf32>
    %418 = arith.mulf %417, %416 : vector<8x32xf32>
    %419 = arith.mulf %418, %386 : vector<8x32xf32>
    %420 = arith.mulf %400, %402 : vector<8x32xf32>
    %421 = arith.addf %419, %420 : vector<8x32xf32>
    %422 = math.tanh %421 : vector<8x32xf32>
    %423 = arith.mulf %410, %422 : vector<8x32xf32>
    %c56 = arith.constant 56 : index
    %c0_257 = arith.constant 0 : index
    %424 = vector.load %arg7[%c56, %c0_257] : memref<64x128xf32, #tpu.memory_space<vmem>>, vector<8x128xf32>
    %c0_258 = arith.constant 0 : index
    %c0_259 = arith.constant 0 : index
    %425 = vector.load %arg3[%c0_258, %c0_259] : memref<32x128xf32, #tpu.memory_space<vmem>>, vector<32x128xf32>
    %cst_260 = arith.constant dense<0.000000e+00> : vector<8x128xf32>
    %426 = tpu.matmul %423, %425, %cst_260 {dimension_numbers = #tpu.dot_dimension_numbers<[1], [0], [0], [1], [0, 0, 1, 1], [], []>} : vector<8x32xf32>, vector<32x128xf32>, vector<8x128xf32> -> vector<8x128xf32>
    %427 = arith.addf %424, %426 : vector<8x128xf32>
    %428 = vector.extract_strided_slice %427 {offsets = [0, 0], sizes = [8, 32], strides = [1, 1]} : vector<8x128xf32> to vector<8x32xf32>
    %cst_261 = arith.constant 5.000000e-01 : f32
    %429 = vector.broadcast %cst_261 : f32 to vector<8x32xf32>
    %430 = arith.mulf %429, %428 : vector<8x32xf32>
    %431 = math.tanh %430 : vector<8x32xf32>
    %cst_262 = arith.constant 1.000000e+00 : f32
    %432 = vector.broadcast %cst_262 : f32 to vector<8x32xf32>
    %433 = arith.addf %431, %432 : vector<8x32xf32>
    %cst_263 = arith.constant 5.000000e-01 : f32
    %434 = vector.broadcast %cst_263 : f32 to vector<8x32xf32>
    %435 = arith.mulf %434, %433 : vector<8x32xf32>
    %436 = vector.extract_strided_slice %427 {offsets = [0, 64], sizes = [8, 32], strides = [1, 1]} : vector<8x128xf32> to vector<8x32xf32>
    %437 = math.tanh %436 : vector<8x32xf32>
    %438 = vector.extract_strided_slice %427 {offsets = [0, 96], sizes = [8, 32], strides = [1, 1]} : vector<8x128xf32> to vector<8x32xf32>
    %cst_264 = arith.constant 5.000000e-01 : f32
    %439 = vector.broadcast %cst_264 : f32 to vector<8x32xf32>
    %440 = arith.mulf %439, %438 : vector<8x32xf32>
    %441 = math.tanh %440 : vector<8x32xf32>
    %cst_265 = arith.constant 1.000000e+00 : f32
    %442 = vector.broadcast %cst_265 : f32 to vector<8x32xf32>
    %443 = arith.addf %441, %442 : vector<8x32xf32>
    %cst_266 = arith.constant 5.000000e-01 : f32
    %444 = vector.broadcast %cst_266 : f32 to vector<8x32xf32>
    %445 = arith.mulf %444, %443 : vector<8x32xf32>
    %446 = vector.extract_strided_slice %427 {offsets = [0, 32], sizes = [8, 32], strides = [1, 1]} : vector<8x128xf32> to vector<8x32xf32>
    %cst_267 = arith.constant 5.000000e-01 : f32
    %447 = vector.broadcast %cst_267 : f32 to vector<8x32xf32>
    %448 = arith.mulf %447, %446 : vector<8x32xf32>
    %449 = math.tanh %448 : vector<8x32xf32>
    %cst_268 = arith.constant 1.000000e+00 : f32
    %450 = vector.broadcast %cst_268 : f32 to vector<8x32xf32>
    %451 = arith.addf %449, %450 : vector<8x32xf32>
    %cst_269 = arith.constant 5.000000e-01 : f32
    %452 = vector.broadcast %cst_269 : f32 to vector<8x32xf32>
    %453 = arith.mulf %452, %451 : vector<8x32xf32>
    %454 = arith.mulf %453, %421 : vector<8x32xf32>
    %455 = arith.mulf %435, %437 : vector<8x32xf32>
    %456 = arith.addf %454, %455 : vector<8x32xf32>
    %457 = math.tanh %456 : vector<8x32xf32>
    %458 = arith.mulf %445, %457 : vector<8x32xf32>
    %c0_270 = arith.constant 0 : index
    %c0_271 = arith.constant 0 : index
    %459 = vector.load %arg4[%c0_270, %c0_271] : memref<32x128xf32, #tpu.memory_space<vmem>>, vector<32x128xf32>
    %cst_272 = arith.constant dense<0.000000e+00> : vector<8x128xf32>
    %460 = tpu.matmul %458, %459, %cst_272 {dimension_numbers = #tpu.dot_dimension_numbers<[1], [0], [0], [1], [0, 0, 1, 1], [], []>} : vector<8x32xf32>, vector<32x128xf32>, vector<8x128xf32> -> vector<8x128xf32>
    %c0_273 = arith.constant 0 : index
    %c0_274 = arith.constant 0 : index
    %461 = vector.load %arg5[%c0_273, %c0_274] : memref<1x128xf32, #tpu.memory_space<vmem>>, vector<1x128xf32>
    %462 = vector.broadcast %461 : vector<1x128xf32> to vector<8x128xf32>
    %463 = arith.addf %460, %462 : vector<8x128xf32>
    %cst_275 = arith.constant 5.000000e-01 : f32
    %464 = vector.broadcast %cst_275 : f32 to vector<8x128xf32>
    %465 = arith.mulf %464, %463 : vector<8x128xf32>
    %466 = math.tanh %465 : vector<8x128xf32>
    %cst_276 = arith.constant 1.000000e+00 : f32
    %467 = vector.broadcast %cst_276 : f32 to vector<8x128xf32>
    %468 = arith.addf %466, %467 : vector<8x128xf32>
    %cst_277 = arith.constant 5.000000e-01 : f32
    %469 = vector.broadcast %cst_277 : f32 to vector<8x128xf32>
    %470 = arith.mulf %469, %468 : vector<8x128xf32>
    %c0_278 = arith.constant 0 : index
    %c0_279 = arith.constant 0 : index
    %471 = vector.load %arg6[%c0_278, %c0_279] : memref<8x128xf32, #tpu.memory_space<vmem>>, vector<8x128xf32>
    tpu.vector_store %arg6[%c0_278, %c0_279], %470 {strides = array<i32>} : memref<8x128xf32, #tpu.memory_space<vmem>>, vector<8x128xf32>,
    return
  }
  func.func @transform_1(%arg0: i32, %arg1: memref<2x8xi32, #tpu.memory_space<smem>>) -> (i32, i32) {
    %c0_i32 = arith.constant 0 : i32
    %c0_i32_0 = arith.constant 0 : i32
    %c0_i32_1 = arith.constant 0 : i32
    return %c0_i32, %c0_i32_0 : i32, i32
  }
  func.func @transform_2(%arg0: i32, %arg1: memref<2x8xi32, #tpu.memory_space<smem>>) -> (i32, i32) {
    %c0_i32 = arith.constant 0 : i32
    %c0_i32_0 = arith.constant 0 : i32
    %c0_i32_1 = arith.constant 0 : i32
    return %c0_i32, %c0_i32_0 : i32, i32
  }
  func.func @transform_3(%arg0: i32, %arg1: memref<2x8xi32, #tpu.memory_space<smem>>) -> (i32, i32) {
    %c0_i32 = arith.constant 0 : i32
    %c0_i32_0 = arith.constant 0 : i32
    %c0_i32_1 = arith.constant 0 : i32
    return %c0_i32, %c0_i32_0 : i32, i32
  }
  func.func @transform_4(%arg0: i32, %arg1: memref<2x8xi32, #tpu.memory_space<smem>>) -> (i32, i32) {
    %c0_i32 = arith.constant 0 : i32
    %c0_i32_0 = arith.constant 0 : i32
    %c0_i32_1 = arith.constant 0 : i32
    return %c0_i32, %c0_i32_0 : i32, i32
  }
}

</mosaic_0001>

<bundles_post_ra>
// kernel: forward.1
= control target key start
LH: loop header
LB: loop body
LE: loop exit
PB: predicated region body
PF: predicated region fallthrough
CT: control target
= control target key end

     0   :  { %s2854_s0 = inlined_call_operand.hbm [shape: s32[2,8], index: 0, kind: input, shape index: {}]   ;;  %s2855_s1 = inlined_call_operand.hbm [shape: f32[5000,128], index: 1, kind: input, shape index: {}]   ;;  %s2856_s2 = inlined_call_operand.hbm [shape: f32[32,128], index: 2, kind: input, shape index: {}]   ;;  %s2857_s3 = inlined_call_operand.hbm [shape: f32[32,128], index: 3, kind: input, shape index: {}]   ;;  %s2858_s4 = inlined_call_operand.hbm [shape: f32[1,128], index: 4, kind: input, shape index: {}]   ;;  %s2859_s5 = inlined_call_operand.vmem [shape: f32[8,128], index: 5, kind: output, shape index: {}]  }
   0x1   :  { %s1799_s20 = scalar_lea.hbm %s2854_s0, 32 }
   0x2   :  { %p1800_p0 = scmp.ne.s32.totalorder %s2854_s0, %s1799_s20  ;;  %p1803_p1 = scmp.lt.u32.totalorder %s1799_s20, %s2854_s0 }
   0x4   :  { %p1805_p2 = pnand %p1803_p1, %p1800_p0 }
   0x6   :  { %1808 = shalt.err (!%p1805_p2)  }
   0x7   :  { %s2297_s25 = smov [#allocation5]  }
   0x8   :  { %11 = dma.hbm_to_smem %s2854_s0, 32, %s2297_s25, [#allocation4] }
   0x9   :  { %2259 = dma.done.wait [#allocation4], 32 }
   0xa   :  { %2260 = vsyncadd [#allocation4], 4294967264 }
   0xb   :  { %13 = sfence }
   0xc   :  { %14 = vsyncpa [#allocation7], 0 }
   0xd   :  { %15 = vsyncpa [#allocation9], 0  ;;  %s2298_s28 = smov [#allocation8]   ;;  %s2299_s30 = smov [#allocation6]  }
   0xe   :  { %s33_s29 = sshll.u32 %s2298_s28, 4  ;;  %s21_s6 = sshll.u32 %s2299_s30, 4  ;;  %s34_s29 = int_to_ptr.vmem [resolvable:$true] %s33_s29  ;;  %s2367_s6 = int_to_ptr.vmem [resolvable:$true] %s21_s6 }
   0xf   :  { %s1809_s9 = scalar_lea.hbm %s2857_s3, 512 }
  0x10   :  { %p1810_p3 = scmp.ne.s32.totalorder %s2857_s3, %s1809_s9  ;;  %p1813_p4 = scmp.lt.u32.totalorder %s1809_s9, %s2857_s3 }
  0x12   :  { %p1815_p5 = pnand %p1813_p4, %p1810_p3 }
  0x14   :  { %1818 = shalt.err (!%p1815_p5)
}
  0x15   :  { %s1819_s13 = scalar_lea.vmem %s34_s29, 512  ;;  %p1824_p7 = scmp.lt.s32.totalorder %s34_s29, %s34_s29 }
  0x16   :  { %p1820_p6 = scmp.ne.s32.totalorder %s34_s29, %s1819_s13  ;;  %p1825_p8 = scmp.lt.s32.totalorder %s1819_s13, %s1819_s13 }
  0x18   :  { %p1826_p9 = por %p1825_p8, %p1824_p7 }
  0x1a   :  { %p1827_p10 = pnand %p1826_p9, %p1820_p6 }
  0x1c   :  { %1830 = shalt.err (!%p1827_p10)
}
  0x1d   :  { %s2300_s14 = smov 128   ;;  %s2301_s15 = smov 8  }
  0x1e   :  { %39 = dma.hbm_to_vmem [thread:$0]  %s2857_s3, 512, %s34_s29, [#allocation9], %s2300_s14, %s2300_s14, %s2301_s15  }
  0x1f   :  { %s1831_s20 = scalar_lea.hbm %s2856_s2, 512 }
  0x20   :  { %p1832_p11 = scmp.ne.s32.totalorder %s2856_s2, %s1831_s20  ;;  %p1835_p12 = scmp.lt.u32.totalorder %s1831_s20, %s2856_s2 }
  0x22   :  { %p1837_p13 = pnand %p1835_p12, %p1832_p11 }
  0x24   :  { %1840 = shalt.err (!%p1837_p13)
}
  0x25   :  { %s1841_s25 = scalar_lea.vmem %s2367_s6, 512  ;;  %p1846_p1 = scmp.lt.s32.totalorder %s2367_s6, %s2367_s6 }
  0x26   :  { %p1842_p0 = scmp.ne.s32.totalorder %s2367_s6, %s1841_s25  ;;  %p1847_p2 = scmp.lt.s32.totalorder %s1841_s25, %s1841_s25 }
  0x28   :  { %p1848_p3 = por %p1847_p2, %p1846_p1 }
  0x2a   :  { %p1849_p4 = pnand %p1848_p3, %p1842_p0 }
  0x2c   :  { %1852 = shalt.err (!%p1849_p4)
}
  0x2d   :  { %27 = dma.hbm_to_vmem [thread:$0]  %s2856_s2, 512, %s2367_s6, [#allocation7], %s2300_s14, %s2300_s14, %s2301_s15  }
  0x2e   :  { %s2302_s27 = smov [#allocation10]   ;;  %s1853_s7 = scalar_lea.hbm %s2858_s4, 16 }
  0x2f   :  { %s46_s28 = sshll.u32 %s2302_s27, 4  ;;  %p1854_p5 = scmp.ne.s32.totalorder %s2858_s4, %s1853_s7  ;;  %s47_s28 = int_to_ptr.vmem [resolvable:$true] %s46_s28 }
  0x30   :  { %p1857_p6 = scmp.lt.u32.totalorder %s1853_s7, %s2858_s4 }
  0x32   :  { %p1859_p7 = pnand %p1857_p6, %p1854_p5 }
  0x34   :  { %1862 = shalt.err (!%p1859_p7)
}
  0x35   :  { %s1863_s0 = scalar_lea.vmem %s47_s28, 16  ;;  %s1867_s2 = scalar_lea.vmem %s47_s28, 32 }
  0x36   :  { %p1864_p8 = scmp.ne.s32.totalorder %s47_s28, %s1863_s0  ;;  %p1868_p9 = scmp.lt.s32.totalorder %s47_s28, %s47_s28 }
  0x37   :  { %p1869_p10 = scmp.lt.s32.totalorder %s1867_s2, %s1863_s0 }
  0x39   :  { %p1870_p11 = por %p1869_p10, %p1868_p9 }
  0x3b   :  { %p1871_p12 = pnand %p1870_p11, %p1864_p8 }
  0x3d   :  { %1874 = shalt.err (!%p1871_p12)
}
  0x3e   :  { %49 = dma.hbm_to_vmem [thread:$0]  %s2858_s4, 16, %s47_s28, [#allocation9]  }
  0x3f   :  { %2261 = dma.done.wait [#allocation7], 512  }
  0x40   :  { %2262 = vsyncadd [#allocation7], 4294966784 }
  0x41   :  { %2263 = dma.done.wait [#allocation9], 528  }
  0x42   :  { %2264 = vsyncadd [#allocation9], 4294966768  ;;  %v2303_v0 = vmov 0.0   ;;  %s67_s4 = sld [smem:[#allocation5]]  ;;  %s2304_s13 = smov [#allocation2]  }
  0x43   :  { %59 = vst [vmem:[#allocation2 + $0x2] sm:$0x3f] %v2303_v0  ;;  %60 = vst [vmem:[#allocation2 + $0xa] sm:$0x3f] %v2303_v0  ;;  %s81_s14 = sshll.u32 %s2304_s13, 4  ;;  %s1383_s15 = sld [smem:[#allocation5 + $0x80]]  ;;  %s2418_s14 = int_to_ptr.vmem [resolvable:$true] %s81_s14 }
  0x44   :  { %61 = vst [vmem:[#allocation2 + $0x12] sm:$0x3f] %v2303_v0  ;;  %62 = vst [vmem:[#allocation2 + $0x1a] sm:$0x3f] %v2303_v0  ;;  %s2305_s16 = smov [#allocation2 + $0x1]   ;;  %s2420_s18 = sld [smem:[#allocation5 + $0x1]] }
  0x45   :  { %63 = vst [vmem:[#allocation2 + $0x22] sm:$0x3f] %v2303_v0  ;;  %64 = vst [vmem:[#allocation2 + $0x2a] sm:$0x3f] %v2303_v0  ;;  %s101_s17 = sshll.u32 %s2305_s16, 4  ;;  %s2306_s19 = smov [#allocation2 + $0x8]   ;;  %s2422_s17 = int_to_ptr.vmem [resolvable:$true] %s101_s17 }
  0x46   :  { %65 = vst [vmem:[#allocation2 + $0x32] sm:$0x3f] %v2303_v0  ;;  %66 = vst [vmem:[#allocation2 + $0x3a] sm:$0x3f] %v2303_v0  ;;  %s121_s20 = sshll.u32 %s2306_s19, 4  ;;  %s2424_s21 = sld [smem:[#allocation5 + $0x81]]  ;;  %s2426_s20 = int_to_ptr.vmem [resolvable:$true] %s121_s20 }
  0x47   :  { %s2435_s29 = scalar_lea.hbm %s2855_s1, 80000 }
  0x48   :  { %p68_p13 = scmp.gt.s32.totalorder %s67_s4, 0  ;;  %p1377_p0 = scmp.lt.s32.totalorder %s67_s4, 4999 }
  0x49   :  { %p86_p1 = scmp.gt.s32.totalorder %s1383_s15, 0  ;;  %p1384_p2 = scmp.lt.s32.totalorder %s1383_s15, 4999 }
  0x4a   :  { %s2865_s4 = smov (!%p68_p13, %s67_s4), 0  ;;  %p106_p3 = scmp.gt.s32.totalorder %s2420_s18, 0 }
  0x4b   :  { %s2867_s15 = smov (!%p86_p1, %s1383_s15), 0  ;;  %s2869_s4 = smov (!%p1377_p0, %s2865_s4), 4999 }
  0x4c   :  { %s2871_s15 = smov (!%p1384_p2, %s2867_s15), 4999  ;;  %s1382_s22 = sshll.u32 %s2869_s4, 4 }
  0x4d   :  { %s73_s25 = scalar_lea.hbm %s2855_s1, %s1382_s22  ;;  %s1389_s3 = sshll.u32 %s2871_s15, 4 }
  0x4e   :  { %s1875_s26 = scalar_lea.hbm %s73_s25, 16  ;;  %p1878_p5 = scmp.lt.u32.totalorder %s73_s25, %s2855_s1 }
  0x4f   :  { %p1876_p4 = scmp.ne.s32.totalorder %s73_s25, %s1875_s26  ;;  %p1879_p6 = scmp.lt.u32.totalorder %s2435_s29, %s1875_s26 }
  0x50   :  { %p1881_p8 = scmp.lt.u32.totalorder %s1875_s26, %s73_s25 }
  0x51   :  { %p1880_p7 = por %p1879_p6, %p1878_p5 }
  0x53   :  { %p1882_p9 = por %p1881_p8, %p1880_p7 }
  0x55   :  { %p1883_p10 = pnand %p1882_p9, %p1876_p4 }
  0x57   :  { %1886 = shalt.err (!%p1883_p10)  }
  0x58   :  { %s1887_s8 = scalar_lea.vmem %s2418_s14, 16  ;;  %s2444_s9 = scalar_lea.vmem %s2418_s14, 1024 }
  0x59   :  { %p1888_p11 = scmp.ne.s32.totalorder %s2418_s14, %s1887_s8  ;;  %p1892_p12 = scmp.lt.s32.totalorder %s2418_s14, %s2418_s14 }
  0x5a   :  { %p1893_p13 = scmp.lt.s32.totalorder %s2444_s9, %s1887_s8 }
  0x5c   :  { %p1894_p0 = por %p1893_p13, %p1892_p12 }
  0x5e   :  { %p1895_p1 = pnand %p1894_p0, %p1888_p11 }
  0x60   :  { %1898 = shalt.err (!%p1895_p1)  }
  0x61   :  { %84 = dma.hbm_to_vmem [thread:$0]  %s73_s25, 16, %s2418_s14, [#allocation3] }
  0x62   :  { %s91_s0 = scalar_lea.hbm %s2855_s1, %s1389_s3  ;;  %p1391_p2 = scmp.lt.s32.totalorder %s2420_s18, 4999 }
  0x63   :  { %s1899_s2 = scalar_lea.hbm %s91_s0, 16  ;;  %p1902_p5 = scmp.lt.u32.totalorder %s91_s0, %s2855_s1 }
  0x64   :  { %p1900_p4 = scmp.ne.s32.totalorder %s91_s0, %s1899_s2  ;;  %p1903_p6 = scmp.lt.u32.totalorder %s2435_s29, %s1899_s2 }
  0x65   :  { %p1905_p8 = scmp.lt.u32.totalorder %s1899_s2, %s91_s0 }
  0x66   :  { %p1904_p7 = por %p1903_p6, %p1902_p5 }
  0x68   :  { %p1906_p9 = por %p1905_p8, %p1904_p7 }
  0x6a   :  { %p1907_p10 = pnand %p1906_p9, %p1900_p4 }
  0x6c   :  { %1910 = shalt.err (!%p1907_p10)  }
  0x6d   :  { %s1911_s4 = scalar_lea.vmem %s2422_s17, 16  ;;  %p1916_p12 = scmp.lt.s32.totalorder %s2422_s17, %s2418_s14 }
  0x6e   :  { %p1912_p11 = scmp.ne.s32.totalorder %s2422_s17, %s1911_s4  ;;  %p1917_p13 = scmp.lt.s32.totalorder %s2444_s9, %s1911_s4 }
  0x70   :  { %p1918_p0 = por %p1917_p13, %p1916_p12 }
  0x72   :  { %p1919_p1 = pnand %p1918_p0, %p1912_p11 }
  0x74   :  { %1922 = shalt.err (!%p1919_p1)  }
  0x75   :  { %104 = dma.hbm_to_vmem [thread:$0]  %s91_s0, 16, %s2422_s17, [#allocation3 + $0x1] }
  0x76   :  { %s107_s13 = scalar_select %p106_p3, %s2420_s18, 0 }
  0x77   :  { %p126_p4 = scmp.gt.s32.totalorder %s2424_s21, 0  ;;  %p1398_p5 = scmp.lt.s32.totalorder %s2424_s21, 4999 }
  0x78   :  { %s2873_s13 = smov (!%p1391_p2, %s107_s13), 4999  ;;  %s2307_s19 = smov [#allocation2 + $0x9]  }
  0x79   :  { %s127_s15 = scalar_select %p126_p4, %s2424_s21, 0 }
  0x7a   :  { %s1396_s16 = sshll.u32 %s2873_s13, 4  ;;  %s141_s22 = sshll.u32 %s2307_s19, 4  ;;  %s2475_s22 = int_to_ptr.vmem [resolvable:$true] %s141_s22 }
  0x7b   :  { %s111_s25 = scalar_lea.hbm %s2855_s1, %s1396_s16 }
  0x7c   :  { %s1923_s3 = scalar_lea.hbm %s111_s25, 16  ;;  %p1926_p3 = scmp.lt.u32.totalorder %s111_s25, %s2855_s1 }
  0x7d   :  { %p1924_p6 = scmp.ne.s32.totalorder %s111_s25, %s1923_s3  ;;  %p1927_p7 = scmp.lt.u32.totalorder %s2435_s29, %s1923_s3 }
  0x7e   :  { %p1929_p9 = scmp.lt.u32.totalorder %s1923_s3, %s111_s25 }
  0x7f   :  { %p1928_p8 = por %p1927_p7, %p1926_p3 }
  0x81   :  { %p1930_p2 = por %p1929_p9, %p1928_p8 }
  0x83   :  { %p1931_p10 = pnand %p1930_p2, %p1924_p6 }
  0x85   :  { %1934 = shalt.err (!%p1931_p10)  }
  0x86   :  { %s1935_s18 = scalar_lea.vmem %s2426_s20, 16  ;;  %p1940_p12 = scmp.lt.s32.totalorder %s2426_s20, %s2418_s14 }
  0x87   :  { %p1936_p11 = scmp.ne.s32.totalorder %s2426_s20, %s1935_s18  ;;  %p1941_p13 = scmp.lt.s32.totalorder %s2444_s9, %s1935_s18 }
  0x89   :  { %p1942_p0 = por %p1941_p13, %p1940_p12 }
  0x8b   :  { %p1943_p1 = pnand %p1942_p0, %p1936_p11 }
  0x8d   :  { %1946 = shalt.err (!%p1943_p1)  }
  0x8e   :  { %124 = dma.hbm_to_vmem [thread:$0]  %s111_s25, 16, %s2426_s20, [#allocation3 + $0x2] }
  0x8f   :  { %s2875_s15 = smov (!%p1398_p5, %s127_s15), 4999  ;;  %s2489_s27 = sld [smem:[#allocation5 + $0x2]] }
  0x90   :  { %s1403_s28 = sshll.u32 %s2875_s15, 4  ;;  %s2308_s30 = smov [#allocation2 + $0x10]  }
  0x91   :  { %s161_s7 = sshll.u32 %s2308_s30, 4  ;;  %s131_s11 = scalar_lea.hbm %s2855_s1, %s1403_s28  ;;  %s2494_s7 = int_to_ptr.vmem [resolvable:$true] %s161_s7 }
  0x92   :  { %s1947_s0 = scalar_lea.hbm %s131_s11, 16  ;;  %p1950_p6 = scmp.lt.u32.totalorder %s131_s11, %s2855_s1 }
  0x93   :  { %p1948_p4 = scmp.ne.s32.totalorder %s131_s11, %s1947_s0  ;;  %p1951_p3 = scmp.lt.u32.totalorder %s2435_s29, %s1947_s0 }
  0x94   :  { %p1953_p5 = scmp.lt.u32.totalorder %s1947_s0, %s131_s11 }
  0x95   :  { %p1952_p7 = por %p1951_p3, %p1950_p6 }
  0x97   :  { %p1954_p8 = por %p1953_p5, %p1952_p7 }
  0x99   :  { %p1955_p9 = pnand %p1954_p8, %p1948_p4 }
  0x9b   :  { %1958 = shalt.err (!%p1955_p9)  }
  0x9c   :  { %s1959_s20 = scalar_lea.vmem %s2475_s22, 16  ;;  %p1964_p10 = scmp.lt.s32.totalorder %s2475_s22, %s2418_s14 }
  0x9d   :  { %p1960_p2 = scmp.ne.s32.totalorder %s2475_s22, %s1959_s20  ;;  %p1965_p11 = scmp.lt.s32.totalorder %s2444_s9, %s1959_s20 }
  0x9f   :  { %p1966_p12 = por %p1965_p11, %p1964_p10 }
  0xa1   :  { %p1967_p13 = pnand %p1966_p12, %p1960_p2 }
  0xa3   :  { %1970 = shalt.err (!%p1967_p13)  }
  0xa4   :  { %144 = dma.hbm_to_vmem [thread:$0]  %s131_s11, 16, %s2475_s22, [#allocation3 + $0x3] }
  0xa5   :  { %s2506_s21 = sld [smem:[#allocation5 + $0x82]]  ;;  %s2309_s12 = smov [#allocation2 + $0x11]  }
  0xa6   :  { %s181_s4 = sshll.u32 %s2309_s12, 4  ;;  %s2508_s13 = sld [smem:[#allocation5 + $0x3]]  ;;  %s2512_s4 = int_to_ptr.vmem [resolvable:$true] %s181_s4 }
  0xa7   :  { %p146_p0 = scmp.gt.s32.totalorder %s2489_s27, 0  ;;  %p1405_p1 = scmp.lt.s32.totalorder %s2489_s27, 4999 }
  0xa8   :  { %s2310_s15 = smov [#allocation2 + $0x18]   ;;  %s2517_s19 = sld [smem:[#allocation5 + $0x83]] }
  0xa9   :  { %s2877_s27 = smov (!%p146_p0, %s2489_s27), 0  ;;  %s2515_s16 = sshll.u32 %s2310_s15, 4  ;;  %s2547_s16 = int_to_ptr.vmem [resolvable:$true] %s2515_s16 }
  0xaa   :  { %s2879_s27 = smov (!%p1405_p1, %s2877_s27), 4999 }
  0xab   :  { %p166_p4 = scmp.gt.s32.totalorder %s2506_s21, 0  ;;  %s1410_s22 = sshll.u32 %s2879_s27, 4 }
  0xac   :  { %p186_p3 = scmp.gt.s32.totalorder %s2508_s13, 0  ;;  %s151_s25 = scalar_lea.hbm %s2855_s1, %s1410_s22 }
  0xad   :  { %s1971_s3 = scalar_lea.hbm %s151_s25, 16  ;;  %p1974_p8 = scmp.lt.u32.totalorder %s151_s25, %s2855_s1 }
  0xae   :  { %p1972_p5 = scmp.ne.s32.totalorder %s151_s25, %s1971_s3  ;;  %p1975_p9 = scmp.lt.u32.totalorder %s2435_s29, %s1971_s3 }
  0xaf   :  { %p1977_p10 = scmp.lt.u32.totalorder %s1971_s3, %s151_s25 }
  0xb0   :  { %p1976_p2 = por %p1975_p9, %p1974_p8 }
  0xb2   :  { %p1978_p11 = por %p1977_p10, %p1976_p2 }
  0xb4   :  { %p1979_p12 = pnand %p1978_p11, %p1972_p5 }
  0xb6   :  { %1982 = shalt.err (!%p1979_p12)  }
  0xb7   :  { %s1983_s18 = scalar_lea.vmem %s2494_s7, 16  ;;  %p1988_p0 = scmp.lt.s32.totalorder %s2494_s7, %s2418_s14 }
  0xb8   :  { %p1984_p13 = scmp.ne.s32.totalorder %s2494_s7, %s1983_s18  ;;  %p1989_p1 = scmp.lt.s32.totalorder %s2444_s9, %s1983_s18 }
  0xba   :  { %p1990_p7 = por %p1989_p1, %p1988_p0 }
  0xbc   :  { %p1991_p6 = pnand %p1990_p7, %p1984_p13 }
  0xbe   :  { %1994 = shalt.err (!%p1991_p6)  }
  0xbf   :  { %164 = dma.hbm_to_vmem [thread:$0]  %s151_s25, 16, %s2494_s7, [#allocation3 + $0x4] }
  0xc0   :  { %s167_s27 = scalar_select %p166_p4, %s2506_s21, 0 }
  0xc1   :  { %s187_s28 = scalar_select %p186_p3, %s2508_s13, 0 }
  0xc2   :  { %p2860_p5 = scmp.lt.s32.totalorder %s2506_s21, 4999  ;;  %p2861_p8 = scmp.lt.s32.totalorder %s2508_s13, 4999 }
  0xc4   :  { %s2881_s27 = smov (!%p2860_p5, %s167_s27), 4999  ;;  %s2883_s28 = smov (!%p2861_p8, %s187_s28), 4999 }
  0xc5   :  { %s1417_s30 = sshll.u32 %s2881_s27, 4  ;;  %s1424_s0 = sshll.u32 %s2883_s28, 4 }
  0xc6   :  { %s171_s11 = scalar_lea.hbm %s2855_s1, %s1417_s30 }
  0xc7   :  { %s1995_s2 = scalar_lea.hbm %s171_s11, 16  ;;  %p1998_p4 = scmp.lt.u32.totalorder %s171_s11, %s2855_s1 }
  0xc8   :  { %p1996_p6 = scmp.ne.s32.totalorder %s171_s11, %s1995_s2  ;;  %p1999_p7 = scmp.lt.u32.totalorder %s2435_s29, %s1995_s2 }
  0xc9   :  { %p2001_p9 = scmp.lt.u32.totalorder %s1995_s2, %s171_s11 }
  0xca   :  { %p2000_p3 = por %p1999_p7, %p1998_p4 }
  0xcc   :  { %p2002_p2 = por %p2001_p9, %p2000_p3 }
  0xce   :  { %p2003_p10 = pnand %p2002_p2, %p1996_p6 }
  0xd0   :  { %2006 = shalt.err (!%p2003_p10)  }
  0xd1   :  { %s2007_s20 = scalar_lea.vmem %s2512_s4, 16  ;;  %p2012_p12 = scmp.lt.s32.totalorder %s2512_s4, %s2418_s14 }
  0xd2   :  { %p2008_p11 = scmp.ne.s32.totalorder %s2512_s4, %s2007_s20  ;;  %p2013_p13 = scmp.lt.s32.totalorder %s2444_s9, %s2007_s20 }
  0xd4   :  { %p2014_p0 = por %p2013_p13, %p2012_p12 }
  0xd6   :  { %p2015_p1 = pnand %p2014_p0, %p2008_p11 }
  0xd8   :  { %2018 = shalt.err (!%p2015_p1)  }
  0xd9   :  { %184 = dma.hbm_to_vmem [thread:$0]  %s171_s11, 16, %s2512_s4, [#allocation3 + $0x5] }
  0xda   :  { %s191_s13 = scalar_lea.hbm %s2855_s1, %s1424_s0  ;;  %p206_p5 = scmp.gt.s32.totalorder %s2517_s19, 0 }
  0xdb   :  { %s2019_s15 = scalar_lea.hbm %s191_s13, 16  ;;  %p2022_p6 = scmp.lt.u32.totalorder %s191_s13, %s2855_s1 }
  0xdc   :  { %p2020_p8 = scmp.ne.s32.totalorder %s191_s13, %s2019_s15  ;;  %p2023_p4 = scmp.lt.u32.totalorder %s2435_s29, %s2019_s15 }
  0xdd   :  { %p2025_p3 = scmp.lt.u32.totalorder %s2019_s15, %s191_s13 }
  0xde   :  { %p2024_p7 = por %p2023_p4, %p2022_p6 }
  0xe0   :  { %p2026_p9 = por %p2025_p3, %p2024_p7 }
  0xe2   :  { %p2027_p2 = pnand %p2026_p9, %p2020_p8 }
  0xe4   :  { %2030 = shalt.err (!%p2027_p2)  }
  0xe5   :  { %s2031_s4 = scalar_lea.vmem %s2547_s16, 16  ;;  %p2036_p11 = scmp.lt.s32.totalorder %s2547_s16, %s2418_s14 }
  0xe6   :  { %p2032_p10 = scmp.ne.s32.totalorder %s2547_s16, %s2031_s4  ;;  %p2037_p12 = scmp.lt.s32.totalorder %s2444_s9, %s2031_s4 }
  0xe8   :  { %p2038_p13 = por %p2037_p12, %p2036_p11 }
  0xea   :  { %p2039_p0 = pnand %p2038_p13, %p2032_p10 }
  0xec   :  { %2042 = shalt.err (!%p2039_p0)  }
  0xed   :  { %204 = dma.hbm_to_vmem [thread:$0]  %s191_s13, 16, %s2547_s16, [#allocation3 + $0x6] }
  0xee   :  { %s207_s24 = scalar_select %p206_p5, %s2517_s19, 0 }
  0xef   :  { %p1426_p1 = scmp.lt.s32.totalorder %s2517_s19, 4999  ;;  %s2311_s25 = smov [#allocation2 + $0x19]  }
  0xf0   :  { %s221_s3 = sshll.u32 %s2311_s25, 4  ;;  %s2580_s26 = sld [smem:[#allocation5 + $0x4]]  ;;  %s222_s3 = int_to_ptr.vmem [resolvable:$true] %s221_s3 }
  0xf1   :  { %s2885_s24 = smov (!%p1426_p1, %s207_s24), 4999  ;;  %s2312_s18 = smov [#allocation2 + $0x20]  }
  0xf2   :  { %s1431_s17 = sshll.u32 %s2885_s24, 4  ;;  %s241_s27 = sshll.u32 %s2312_s18, 4  ;;  %s2585_s27 = int_to_ptr.vmem [resolvable:$true] %s241_s27 }
  0xf3   :  { %s211_s8 = scalar_lea.hbm %s2855_s1, %s1431_s17 }
  0xf4   :  { %s2043_s16 = scalar_lea.hbm %s211_s8, 16  ;;  %p2046_p5 = scmp.lt.u32.totalorder %s211_s8, %s2855_s1 }
  0xf5   :  { %p2044_p8 = scmp.ne.s32.totalorder %s211_s8, %s2043_s16  ;;  %p2047_p6 = scmp.lt.u32.totalorder %s2435_s29, %s2043_s16 }
  0xf6   :  { %p2049_p7 = scmp.lt.u32.totalorder %s2043_s16, %s211_s8 }
  0xf7   :  { %p2048_p4 = por %p2047_p6, %p2046_p5 }
  0xf9   :  { %p2050_p3 = por %p2049_p7, %p2048_p4 }
  0xfb   :  { %p2051_p9 = pnand %p2050_p3, %p2044_p8 }
  0xfd   :  { %2054 = shalt.err (!%p2051_p9)  }
  0xfe   :  { %s2055_s19 = scalar_lea.vmem %s222_s3, 16  ;;  %p2060_p10 = scmp.lt.s32.totalorder %s222_s3, %s2418_s14 }
  0xff   :  { %p2056_p2 = scmp.ne.s32.totalorder %s222_s3, %s2055_s19  ;;  %p2061_p11 = scmp.lt.s32.totalorder %s2444_s9, %s2055_s19 }
 0x101   :  { %p2062_p12 = por %p2061_p11, %p2060_p10 }
 0x103   :  { %p2063_p13 = pnand %p2062_p12, %p2056_p2 }
 0x105   :  { %2066 = shalt.err (!%p2063_p13)  }
 0x106   :  { %224 = dma.hbm_to_vmem [thread:$0]  %s211_s8, 16, %s222_s3, [#allocation3 + $0x7] }
 0x107   :  { %p226_p0 = scmp.gt.s32.totalorder %s2580_s26, 0  ;;  %p1433_p1 = scmp.lt.s32.totalorder %s2580_s26, 4999 }
 0x108   :  { %s2595_s0 = sld [smem:[#allocation5 + $0x84]]  ;;  %s2313_s2 = smov [#allocation2 + $0x21]  }
 0x109   :  { %s2887_s26 = smov (!%p226_p0, %s2580_s26), 0  ;;  %s261_s6 = sshll.u32 %s2313_s2, 4  ;;  %s2600_s6 = int_to_ptr.vmem [resolvable:$true] %s261_s6 }
 0x10a   :  { %s2598_s7 = sld [smem:[#allocation5 + $0x5]]  ;;  %s2889_s26 = smov (!%p1433_p1, %s2887_s26), 4999 }
 0x10b   :  { %s1438_s20 = sshll.u32 %s2889_s26, 4  ;;  %s2314_s21 = smov [#allocation2 + $0x28]  }
 0x10c   :  { %s281_s12 = sshll.u32 %s2314_s21, 4  ;;  %s231_s22 = scalar_lea.hbm %s2855_s1, %s1438_s20  ;;  %s2622_s12 = int_to_ptr.vmem [resolvable:$true] %s281_s12 }
 0x10d   :  { %s2067_s23 = scalar_lea.hbm %s231_s22, 16  ;;  %p2070_p6 = scmp.lt.u32.totalorder %s231_s22, %s2855_s1 }
 0x10e   :  { %p246_p8 = scmp.gt.s32.totalorder %s2595_s0, 0  ;;  %p2068_p5 = scmp.ne.s32.totalorder %s231_s22, %s2067_s23 }
 0x10f   :  { %p2071_p4 = scmp.lt.u32.totalorder %s2435_s29, %s2067_s23  ;;  %p2073_p3 = scmp.lt.u32.totalorder %s2067_s23, %s231_s22 }
 0x111   :  { %p2072_p7 = por %p2071_p4, %p2070_p6 }
 0x113   :  { %p2074_p9 = por %p2073_p3, %p2072_p7 }
 0x115   :  { %p2075_p2 = pnand %p2074_p9, %p2068_p5 }
 0x117   :  { %2078 = shalt.err (!%p2075_p2)  }
 0x118   :  { %s2079_s25 = scalar_lea.vmem %s2585_s27, 16  ;;  %p2084_p11 = scmp.lt.s32.totalorder %s2585_s27, %s2418_s14 }
 0x119   :  { %p2080_p10 = scmp.ne.s32.totalorder %s2585_s27, %s2079_s25  ;;  %p2085_p12 = scmp.lt.s32.totalorder %s2444_s9, %s2079_s25 }
 0x11b   :  { %p2086_p13 = por %p2085_p12, %p2084_p11 }
 0x11d   :  { %p2087_p0 = pnand %p2086_p13, %p2080_p10 }
 0x11f   :  { %2090 = shalt.err (!%p2087_p0)  }
 0x120   :  { %244 = dma.hbm_to_vmem [thread:$0]  %s231_s22, 16, %s2585_s27, [#allocation3 + $0x8] }
 0x121   :  { %s247_s3 = scalar_select %p246_p8, %s2595_s0, 0 }
 0x122   :  { %p1440_p1 = scmp.lt.s32.totalorder %s2595_s0, 4999  ;;  %p266_p5 = scmp.gt.s32.totalorder %s2598_s7, 0 }
 0x123   :  { %p1447_p6 = scmp.lt.s32.totalorder %s2598_s7, 4999  ;;  %s2625_s18 = sld [smem:[#allocation5 + $0x85]] }
 0x124   :  { %s2891_s3 = smov (!%p1440_p1, %s247_s3), 4999 }
 0x125   :  { %s267_s26 = scalar_select %p266_p5, %s2598_s7, 0 }
 0x126   :  { %s1445_s17 = sshll.u32 %s2891_s3, 4 }
 0x127   :  { %s251_s8 = scalar_lea.hbm %s2855_s1, %s1445_s17 }
 0x128   :  { %s2091_s16 = scalar_lea.hbm %s251_s8, 16  ;;  %p2094_p8 = scmp.lt.u32.totalorder %s251_s8, %s2855_s1 }
 0x129   :  { %p2092_p4 = scmp.ne.s32.totalorder %s251_s8, %s2091_s16  ;;  %p2095_p7 = scmp.lt.u32.totalorder %s2435_s29, %s2091_s16 }
 0x12a   :  { %p2097_p9 = scmp.lt.u32.totalorder %s2091_s16, %s251_s8 }
 0x12b   :  { %p2096_p3 = por %p2095_p7, %p2094_p8 }
 0x12d   :  { %p2098_p2 = por %p2097_p9, %p2096_p3 }
 0x12f   :  { %p2099_p10 = pnand %p2098_p2, %p2092_p4 }
 0x131   :  { %2102 = shalt.err (!%p2099_p10)  }
 0x132   :  { %s2103_s11 = scalar_lea.vmem %s2600_s6, 16  ;;  %p2108_p12 = scmp.lt.s32.totalorder %s2600_s6, %s2418_s14 }
 0x133   :  { %p2104_p11 = scmp.ne.s32.totalorder %s2600_s6, %s2103_s11  ;;  %p2109_p13 = scmp.lt.s32.totalorder %s2444_s9, %s2103_s11 }
 0x135   :  { %p2110_p0 = por %p2109_p13, %p2108_p12 }
 0x137   :  { %p2111_p1 = pnand %p2110_p0, %p2104_p11 }
 0x139   :  { %2114 = shalt.err (!%p2111_p1)  }
 0x13a   :  { %264 = dma.hbm_to_vmem [thread:$0]  %s251_s8, 16, %s2600_s6, [#allocation3 + $0x9] }
 0x13b   :  { %s2893_s26 = smov (!%p1447_p6, %s267_s26), 4999  ;;  %s2315_s19 = smov [#allocation2 + $0x29]  }
 0x13c   :  { %s301_s0 = sshll.u32 %s2315_s19, 4  ;;  %s2642_s2 = sld [smem:[#allocation5 + $0x6]]  ;;  %s2644_s0 = int_to_ptr.vmem [resolvable:$true] %s301_s0 }
 0x13d   :  { %s1452_s20 = sshll.u32 %s2893_s26, 4  ;;  %p286_p5 = scmp.gt.s32.totalorder %s2625_s18, 0 }
 0x13e   :  { %s271_s15 = scalar_lea.hbm %s2855_s1, %s1452_s20 }
 0x13f   :  { %s2115_s22 = scalar_lea.hbm %s271_s15, 16  ;;  %p2118_p8 = scmp.lt.u32.totalorder %s271_s15, %s2855_s1 }
 0x140   :  { %p2116_p4 = scmp.ne.s32.totalorder %s271_s15, %s2115_s22  ;;  %p2119_p7 = scmp.lt.u32.totalorder %s2435_s29, %s2115_s22 }
 0x141   :  { %p2121_p3 = scmp.lt.u32.totalorder %s2115_s22, %s271_s15 }
 0x142   :  { %p2120_p6 = por %p2119_p7, %p2118_p8 }
 0x144   :  { %p2122_p9 = por %p2121_p3, %p2120_p6 }
 0x146   :  { %p2123_p2 = pnand %p2122_p9, %p2116_p4 }
 0x148   :  { %2126 = shalt.err (!%p2123_p2)  }
 0x149   :  { %s2127_s6 = scalar_lea.vmem %s2622_s12, 16  ;;  %p2132_p11 = scmp.lt.s32.totalorder %s2622_s12, %s2418_s14 }
 0x14a   :  { %p2128_p10 = scmp.ne.s32.totalorder %s2622_s12, %s2127_s6  ;;  %p2133_p12 = scmp.lt.s32.totalorder %s2444_s9, %s2127_s6 }
 0x14c   :  { %p2134_p13 = por %p2133_p12, %p2132_p11 }
 0x14e   :  { %p2135_p0 = pnand %p2134_p13, %p2128_p10 }
 0x150   :  { %2138 = shalt.err (!%p2135_p0)  }
 0x151   :  { %284 = dma.hbm_to_vmem [thread:$0]  %s271_s15, 16, %s2622_s12, [#allocation3 + $0xa] }
 0x152   :  { %s287_s7 = scalar_select %p286_p5, %s2625_s18, 0 }
 0x153   :  { %p1454_p1 = scmp.lt.s32.totalorder %s2625_s18, 4999  ;;  %p306_p4 = scmp.gt.s32.totalorder %s2642_s2, 0 }
 0x154   :  { %p1461_p8 = scmp.lt.s32.totalorder %s2642_s2, 4999  ;;  %s2316_s3 = smov [#allocation2 + $0x30]  }
 0x155   :  { %s2895_s7 = smov (!%p1454_p1, %s287_s7), 4999  ;;  %s321_s26 = sshll.u32 %s2316_s3, 4  ;;  %s2670_s26 = int_to_ptr.vmem [resolvable:$true] %s321_s26 }
 0x156   :  { %s307_s24 = scalar_select %p306_p4, %s2642_s2, 0 }
 0x157   :  { %s1459_s25 = sshll.u32 %s2895_s7, 4 }
 0x158   :  { %s291_s30 = scalar_lea.hbm %s2855_s1, %s1459_s25 }
 0x159   :  { %s2139_s8 = scalar_lea.hbm %s291_s30, 16  ;;  %p2142_p5 = scmp.lt.u32.totalorder %s291_s30, %s2855_s1 }
 0x15a   :  { %p2140_p7 = scmp.ne.s32.totalorder %s291_s30, %s2139_s8  ;;  %p2143_p6 = scmp.lt.u32.totalorder %s2435_s29, %s2139_s8 }
 0x15b   :  { %p2145_p9 = scmp.lt.u32.totalorder %s2139_s8, %s291_s30 }
 0x15c   :  { %p2144_p3 = por %p2143_p6, %p2142_p5 }
 0x15e   :  { %p2146_p2 = por %p2145_p9, %p2144_p3 }
 0x160   :  { %p2147_p10 = pnand %p2146_p2, %p2140_p7 }
 0x162   :  { %2150 = shalt.err (!%p2147_p10)  }
 0x163   :  { %s2151_s18 = scalar_lea.vmem %s2644_s0, 16  ;;  %p2156_p12 = scmp.lt.s32.totalorder %s2644_s0, %s2418_s14 }
 0x164   :  { %p2152_p11 = scmp.ne.s32.totalorder %s2644_s0, %s2151_s18  ;;  %p2157_p13 = scmp.lt.s32.totalorder %s2444_s9, %s2151_s18 }
 0x166   :  { %p2158_p0 = por %p2157_p13, %p2156_p12 }
 0x168   :  { %p2159_p1 = pnand %p2158_p0, %p2152_p11 }
 0x16a   :  { %2162 = shalt.err (!%p2159_p1)  }
 0x16b   :  { %304 = dma.hbm_to_vmem [thread:$0]  %s291_s30, 16, %s2644_s0, [#allocation3 + $0xb] }
 0x16c   :  { %s2897_s24 = smov (!%p1461_p8, %s307_s24), 4999  ;;  %s2684_s10 = sld [smem:[#allocation5 + $0x86]] }
 0x16d   :  { %s1466_s27 = sshll.u32 %s2897_s24, 4  ;;  %s2317_s21 = smov [#allocation2 + $0x31]  }
 0x16e   :  { %s311_s20 = scalar_lea.hbm %s2855_s1, %s1466_s27  ;;  %s341_s13 = sshll.u32 %s2317_s21, 4  ;;  %s342_s13 = int_to_ptr.vmem [resolvable:$true] %s341_s13 }
 0x16f   :  { %s2163_s15 = scalar_lea.hbm %s311_s20, 16  ;;  %p2166_p7 = scmp.lt.u32.totalorder %s311_s20, %s2855_s1 }
 0x170   :  { %p2164_p4 = scmp.ne.s32.totalorder %s311_s20, %s2163_s15  ;;  %p2167_p5 = scmp.lt.u32.totalorder %s2435_s29, %s2163_s15 }
 0x171   :  { %p2169_p3 = scmp.lt.u32.totalorder %s2163_s15, %s311_s20 }
 0x172   :  { %p2168_p6 = por %p2167_p5, %p2166_p7 }
 0x174   :  { %p2170_p9 = por %p2169_p3, %p2168_p6 }
 0x176   :  { %p2171_p8 = pnand %p2170_p9, %p2164_p4 }
 0x178   :  { %2174 = shalt.err (!%p2171_p8)  }
 0x179   :  { %s2175_s0 = scalar_lea.vmem %s2670_s26, 16  ;;  %p2180_p10 = scmp.lt.s32.totalorder %s2670_s26, %s2418_s14 }
 0x17a   :  { %p2176_p2 = scmp.ne.s32.totalorder %s2670_s26, %s2175_s0  ;;  %p2181_p11 = scmp.lt.s32.totalorder %s2444_s9, %s2175_s0 }
 0x17c   :  { %p2182_p12 = por %p2181_p11, %p2180_p10 }
 0x17e   :  { %p2183_p13 = pnand %p2182_p12, %p2176_p2 }
 0x180   :  { %2186 = shalt.err (!%p2183_p13)  }
 0x181   :  { %324 = dma.hbm_to_vmem [thread:$0]  %s311_s20, 16, %s2670_s26, [#allocation3 + $0xc] }
 0x182   :  { %s2699_s2 = sld [smem:[#allocation5 + $0x7]]  ;;  %s2318_s4 = smov [#allocation2 + $0x38]  }
 0x183   :  { %s361_s6 = sshll.u32 %s2318_s4, 4  ;;  %s2701_s7 = sld [smem:[#allocation5 + $0x87]]  ;;  %s2706_s6 = int_to_ptr.vmem [resolvable:$true] %s361_s6 }
 0x184   :  { %p326_p0 = scmp.gt.s32.totalorder %s2684_s10, 0  ;;  %p1468_p1 = scmp.lt.s32.totalorder %s2684_s10, 4999 }
 0x185   :  { %s2319_s24 = smov [#allocation2 + $0x39]  }
 0x186   :  { %s2899_s10 = smov (!%p326_p0, %s2684_s10), 0  ;;  %s2708_s25 = sshll.u32 %s2319_s24, 4  ;;  %s2734_s25 = int_to_ptr.vmem [resolvable:$true] %s2708_s25 }
 0x187   :  { %s2901_s10 = smov (!%p1468_p1, %s2899_s10), 4999 }
 0x188   :  { %p346_p4 = scmp.gt.s32.totalorder %s2699_s2, 0  ;;  %s1473_s3 = sshll.u32 %s2901_s10, 4 }
 0x189   :  { %p366_p5 = scmp.gt.s32.totalorder %s2701_s7, 0  ;;  %s331_s28 = scalar_lea.hbm %s2855_s1, %s1473_s3 }
 0x18a   :  { %s2187_s30 = scalar_lea.hbm %s331_s28, 16  ;;  %p2190_p9 = scmp.lt.u32.totalorder %s331_s28, %s2855_s1 }
 0x18b   :  { %p2188_p3 = scmp.ne.s32.totalorder %s331_s28, %s2187_s30  ;;  %p2191_p8 = scmp.lt.u32.totalorder %s2435_s29, %s2187_s30 }
 0x18c   :  { %p2193_p10 = scmp.lt.u32.totalorder %s2187_s30, %s331_s28 }
 0x18d   :  { %p2192_p2 = por %p2191_p8, %p2190_p9 }
 0x18f   :  { %p2194_p11 = por %p2193_p10, %p2192_p2 }
 0x191   :  { %p2195_p12 = pnand %p2194_p11, %p2188_p3 }
 0x193   :  { %2198 = shalt.err (!%p2195_p12)  }
 0x194   :  { %s2199_s12 = scalar_lea.vmem %s342_s13, 16  ;;  %p2204_p0 = scmp.lt.s32.totalorder %s342_s13, %s2418_s14 }
 0x195   :  { %p2200_p13 = scmp.ne.s32.totalorder %s342_s13, %s2199_s12  ;;  %p2205_p1 = scmp.lt.s32.totalorder %s2444_s9, %s2199_s12 }
 0x197   :  { %p2206_p7 = por %p2205_p1, %p2204_p0 }
 0x199   :  { %p2207_p6 = pnand %p2206_p7, %p2200_p13 }
 0x19b   :  { %2210 = shalt.err (!%p2207_p6)  }
 0x19c   :  { %344 = dma.hbm_to_vmem [thread:$0]  %s331_s28, 16, %s342_s13, [#allocation3 + $0xd] }
 0x19d   :  { %s347_s18 = scalar_select %p346_p4, %s2699_s2, 0 }
 0x19e   :  { %s367_s10 = scalar_select %p366_p5, %s2701_s7, 0 }
 0x19f   :  { %p2862_p3 = scmp.lt.s32.totalorder %s2699_s2, 4999  ;;  %p2863_p9 = scmp.lt.s32.totalorder %s2701_s7, 4999 }
 0x1a1   :  { %s2903_s18 = smov (!%p2862_p3, %s347_s18), 4999  ;;  %s2905_s10 = smov (!%p2863_p9, %s367_s10), 4999 }
 0x1a2   :  { %s1480_s27 = sshll.u32 %s2903_s18, 4  ;;  %s1487_s21 = sshll.u32 %s2905_s10, 4 }
 0x1a3   :  { %s351_s20 = scalar_lea.hbm %s2855_s1, %s1480_s27 }
 0x1a4   :  { %s2211_s13 = scalar_lea.hbm %s351_s20, 16  ;;  %p2214_p4 = scmp.lt.u32.totalorder %s351_s20, %s2855_s1 }
 0x1a5   :  { %p2212_p7 = scmp.ne.s32.totalorder %s351_s20, %s2211_s13  ;;  %p2215_p6 = scmp.lt.u32.totalorder %s2435_s29, %s2211_s13 }
 0x1a6   :  { %p2217_p8 = scmp.lt.u32.totalorder %s2211_s13, %s351_s20 }
 0x1a7   :  { %p2216_p5 = por %p2215_p6, %p2214_p4 }
 0x1a9   :  { %p2218_p2 = por %p2217_p8, %p2216_p5 }
 0x1ab   :  { %p2219_p10 = pnand %p2218_p2, %p2212_p7 }
 0x1ad   :  { %2222 = shalt.err (!%p2219_p10)  }
 0x1ae   :  { %s2223_s23 = scalar_lea.vmem %s2706_s6, 16  ;;  %p2228_p12 = scmp.lt.s32.totalorder %s2706_s6, %s2418_s14 }
 0x1af   :  { %p2224_p11 = scmp.ne.s32.totalorder %s2706_s6, %s2223_s23  ;;  %p2229_p13 = scmp.lt.s32.totalorder %s2444_s9, %s2223_s23 }
 0x1b1   :  { %p2230_p0 = por %p2229_p13, %p2228_p12 }
 0x1b3   :  { %p2231_p1 = pnand %p2230_p0, %p2224_p11 }
 0x1b5   :  { %2234 = shalt.err (!%p2231_p1)  }
 0x1b6   :  { %364 = dma.hbm_to_vmem [thread:$0]  %s351_s20, 16, %s2706_s6, [#allocation3 + $0xe] }
 0x1b7   :  { %s371_s4 = scalar_lea.hbm %s2855_s1, %s1487_s21 }
 0x1b8   :  { %s2235_s7 = scalar_lea.hbm %s371_s4, 16  ;;  %p2238_p9 = scmp.lt.u32.totalorder %s371_s4, %s2855_s1 }
 0x1b9   :  { %p2236_p3 = scmp.ne.s32.totalorder %s371_s4, %s2235_s7  ;;  %p2239_p7 = scmp.lt.u32.totalorder %s2435_s29, %s2235_s7 }
 0x1ba   :  { %p2241_p6 = scmp.lt.u32.totalorder %s2235_s7, %s371_s4 }
 0x1bb   :  { %p2240_p4 = por %p2239_p7, %p2238_p9 }
 0x1bd   :  { %p2242_p5 = por %p2241_p6, %p2240_p4 }
 0x1bf   :  { %p2243_p8 = pnand %p2242_p5, %p2236_p3 }
 0x1c1   :  { %2246 = shalt.err (!%p2243_p8)  }
 0x1c2   :  { %s2247_s6 = scalar_lea.vmem %s2734_s25, 16  ;;  %p2252_p10 = scmp.lt.s32.totalorder %s2734_s25, %s2418_s14 }
 0x1c3   :  { %p2248_p2 = scmp.ne.s32.totalorder %s2734_s25, %s2247_s6  ;;  %p2253_p11 = scmp.lt.s32.totalorder %s2444_s9, %s2247_s6 }
 0x1c5   :  { %p2254_p12 = por %p2253_p11, %p2252_p10 }
 0x1c7   :  { %p2255_p13 = pnand %p2254_p12, %p2248_p2 }
 0x1c9   :  { %2258 = shalt.err (!%p2255_p13)  }
 0x1ca   :  { %384 = dma.hbm_to_vmem [thread:$0]  %s371_s4, 16, %s2734_s25, [#allocation3 + $0xf] }
 0x1cb   :  { %2265 = dma.done.wait [#allocation3], 16 }
 0x1cc   :  { %2266 = vsyncadd [#allocation3], 4294967280 }
 0x1cd   :  { %2267 = dma.done.wait [#allocation3 + $0x1], 16 }
 0x1ce   :  { %2268 = vsyncadd [#allocation3 + $0x1], 4294967280 }
 0x1cf   :  { %2269 = dma.done.wait [#allocation3 + $0x2], 16 }
 0x1d0   :  { %2270 = vsyncadd [#allocation3 + $0x2], 4294967280 }
 0x1d1   :  { %2271 = dma.done.wait [#allocation3 + $0x3], 16 }
 0x1d2   :  { %2272 = vsyncadd [#allocation3 + $0x3], 4294967280 }
 0x1d3   :  { %2273 = dma.done.wait [#allocation3 + $0x4], 16 }
 0x1d4   :  { %2274 = vsyncadd [#allocation3 + $0x4], 4294967280 }
 0x1d5   :  { %2275 = dma.done.wait [#allocation3 + $0x5], 16 }
 0x1d6   :  { %2276 = vsyncadd [#allocation3 + $0x5], 4294967280 }
 0x1d7   :  { %2277 = dma.done.wait [#allocation3 + $0x6], 16 }
 0x1d8   :  { %2278 = vsyncadd [#allocation3 + $0x6], 4294967280 }
 0x1d9   :  { %2279 = dma.done.wait [#allocation3 + $0x7], 16 }
 0x1da   :  { %2280 = vsyncadd [#allocation3 + $0x7], 4294967280 }
 0x1db   :  { %2281 = dma.done.wait [#allocation3 + $0x8], 16 }
 0x1dc   :  { %2282 = vsyncadd [#allocation3 + $0x8], 4294967280 }
 0x1dd   :  { %2283 = dma.done.wait [#allocation3 + $0x9], 16 }
 0x1de   :  { %2284 = vsyncadd [#allocation3 + $0x9], 4294967280 }
 0x1df   :  { %2285 = dma.done.wait [#allocation3 + $0xa], 16 }
 0x1e0   :  { %2286 = vsyncadd [#allocation3 + $0xa], 4294967280 }
 0x1e1   :  { %2287 = dma.done.wait [#allocation3 + $0xb], 16 }
 0x1e2   :  { %2288 = vsyncadd [#allocation3 + $0xb], 4294967280 }
 0x1e3   :  { %2289 = dma.done.wait [#allocation3 + $0xc], 16 }
 0x1e4   :  { %2290 = vsyncadd [#allocation3 + $0xc], 4294967280 }
 0x1e5   :  { %2291 = dma.done.wait [#allocation3 + $0xd], 16 }
 0x1e6   :  { %2292 = vsyncadd [#allocation3 + $0xd], 4294967280 }
 0x1e7   :  { %2293 = dma.done.wait [#allocation3 + $0xe], 16 }
 0x1e8   :  { %2294 = vsyncadd [#allocation3 + $0xe], 4294967280 }
 0x1e9   :  { %2295 = dma.done.wait [#allocation3 + $0xf], 16 }
 0x1ea   :  { %2296 = vsyncadd [#allocation3 + $0xf], 4294967280  ;;  %v418_v1 = vld [vmem:[#allocation2] sm:$0xff]  ;;  %s2320_s1 = smov 64   ;;  %v437_v10 = vld [vmem:[#allocation6 + $0x8] sm:$0xff]  ;;  %v2321_v12 = vmov 0.0|0.0  }
 0x1eb   :  { %1749 = vtanh.f32 %v418_v1  ;;  %v419_v3 = vmul.f32 0.5, %v418_v1  ;;  %v436_v9 = vld [vmem:[#allocation6] sm:$0xff]  ;;  %v438_v11 = vld [vmem:[#allocation6 + $0x10] sm:$0xff]  ;;  %1673 = vmatprep.subr.bf16.mxu0 %v2321_v12  ;;  %v439_v14 = vld [vmem:[#allocation6 + $0x18] sm:$0xff]  ;;  %vm2322_vm0 = vmmov 0   ;;  %1679 = vmatprep.subr.bf16.mxu1 %v2321_v12  ;;  %s2323_s14 = smov 96  }
 0x1ec   :  { %v2764_v13 = vpack.c.bf16 %v437_v10, %v436_v9  ;;  %1593 = vmatprep.mubr.msk.f32.mxu0 %vm2322_vm0, %v2303_v0  ;;  %1604 = vmatprep.mubr.msk.f32.mxu1 %vm2322_vm0, %v2303_v0  ;;  %v2772_v15 = vpack.c.bf16 %v439_v14, %v438_v11  ;;  %s2324_s29 = smov 32   ;;  %vm443_vm1 = vcmask 261120   ;;  %v435_v20 = vld [vmem:[#allocation2 + $0x8] sm:$0xff]  ;;  %v543_v39 = vld [vmem:[#allocation2 + $0x10] sm:$0xff]  ;;  %v642_v57 = vld [vmem:[#allocation2 + $0x18] sm:$0xff] }
 0x1ed   :  { %1751 = vtanh.f32 %v419_v3  ;;  %v741_v14 = vld [vmem:[#allocation2 + $0x20] sm:$0xff] }
 0x1ee   :  { %1675 = vmatpush3.bf16.msra.mxu0 %v2764_v13  ;;  %1681 = vmatpush3.bf16.msra.mxu1 %v2764_v13 }
 0x1ef   :  { %1676 = vmatprep.subr.bf16.mxu0 %v2321_v12  ;;  %1682 = vmatprep.subr.bf16.mxu1 %v2321_v12 }
 0x1f2   :  { %1678 = vmatpush3.bf16.msra.mxu0 %v2772_v15  ;;  %1684 = vmatpush3.bf16.msra.mxu1 %v2772_v15 }
 0x1f3   :  { %1685 = vmatprep.subr.bf16.mxu0 %v2321_v12  ;;  %1691 = vmatprep.subr.bf16.mxu1 %v2321_v12 }
 0x1f5   :  { %v1750_v2 = vpop.eup %1749 }
 0x1f6   :  { %425 = vrot.lane.b32.xlu0 %v1750_v2, %s2320_s1 }
 0x1f7   :  { %v1752_v4 = vpop.eup %1751 }
 0x1f8   :  { %v421_v5 = vadd.f32 1.0, %v1752_v4 }
 0x1fa   :  { %v422_v6 = vmul.f32 0.5, %v421_v5 }
 0x268   :  { %v426_v7 = vpop.permute.xlu0 %425 }
 0x269   :  { %v428_v8 = vmul.f32 %v426_v7, %v422_v6 }
 0x26b   :  { %1753 = vtanh.f32 %v428_v8 }
 0x275   :  { %v1754_v16 = vpop.eup %1753 }
 0x276   :  { %431 = vrot.lane.b32.xlu0 %v1754_v16, %s2323_s14 }
 0x27a   :  { %523 = vrot.lane.b32.xlu0 %v428_v8, %s2324_s29 }
 0x2e8   :  { %v432_v17 = vpop.permute.xlu0 %431 }
 0x2e9   :  { %v434_v18 = vmul.f32 %v432_v17, %v422_v6 }
 0x2eb   :  { %441 = vrot.lane.b32.xlu1 %v434_v18, %s2324_s29 }
 0x2ec   :  { %v524_v31 = vpop.permute.xlu0 %523 }
 0x35d   :  { %v442_v19 = vpop.permute.xlu1 %441 }
 0x35e   :  { %1594 = vmatmul.mubr.msk.f32.vlgmr.msra.gmra.mrb[0].mxu0 %vm443_vm1, %v442_v19 }
 0x35f   :  { %1687 = vmatpush3.bf16.msra.mxu0 %v2764_v13  ;;  %1615 = vmatprep.mubr.msk.f32.mxu0 %vm2322_vm0, %v2303_v0 }
 0x360   :  { %1688 = vmatprep.subr.bf16.mxu0 %v2321_v12 }
 0x363   :  { %1690 = vmatpush3.bf16.msra.mxu0 %v2772_v15 }
 0x364   :  { %1697 = vmatprep.subr.bf16.mxu0 %v2321_v12 }
 0x431   :  { %v512_v21 = vpop.f32.mrb[0].mxu0 }
 0x432   :  { %v516_v22 = vadd.f32 %v512_v21, %v435_v20  ;;  %v1595_v23 = vpop.f32.mrb[1].mxu0 }
 0x434   :  { %1755 = vtanh.f32 %v516_v22  ;;  %v517_v25 = vmul.f32 0.5, %v516_v22 }
 0x436   :  { %1757 = vtanh.f32 %v517_v25 }
 0x43e   :  { %v1756_v24 = vpop.eup %1755 }
 0x43f   :  { %528 = vrot.lane.b32.xlu1 %v1756_v24, %s2320_s1 }
 0x440   :  { %v1758_v26 = vpop.eup %1757 }
 0x441   :  { %v519_v27 = vadd.f32 1.0, %v1758_v26 }
 0x443   :  { %v520_v28 = vmul.f32 0.5, %v519_v27 }
 0x445   :  { %v526_v32 = vmul.f32 %v524_v31, %v520_v28 }
 0x4b1   :  { %v529_v29 = vpop.permute.xlu1 %528 }
 0x4b2   :  { %v531_v30 = vmul.f32 %v529_v29, %v520_v28 }
 0x4b4   :  { %533 = vrot.lane.b32.xlu1 %v531_v30, %s2324_s29 }
 0x526   :  { %v534_v33 = vpop.permute.xlu1 %533 }
 0x527   :  { %v536_v34 = vadd.f32 %v534_v33, %v526_v32  ;;  %v840_v33 = vld [vmem:[#allocation2 + $0x28] sm:$0xff] }
 0x529   :  { %1759 = vtanh.f32 %v536_v34 }
 0x533   :  { %v1760_v35 = vpop.eup %1759 }
 0x534   :  { %539 = vrot.lane.b32.xlu0 %v1760_v35, %s2320_s1 }
 0x5a6   :  { %v540_v36 = vpop.permute.xlu0 %539 }
 0x5a7   :  { %v542_v37 = vmul.f32 %v540_v36, %v520_v28 }
 0x5a9   :  { %545 = vrot.lane.b32.xlu1 %v542_v37, %s2324_s29 }
 0x61b   :  { %v546_v38 = vpop.permute.xlu1 %545 }
 0x61c   :  { %1605 = vmatmul.mubr.msk.f32.vlgmr.msra.gmra.mrb[0].mxu1 %vm443_vm1, %v546_v38 }
 0x61d   :  { %1693 = vmatpush3.bf16.msra.mxu1 %v2764_v13  ;;  %1626 = vmatprep.mubr.msk.f32.mxu1 %vm2322_vm0, %v2303_v0 }
 0x61e   :  { %1694 = vmatprep.subr.bf16.mxu1 %v2321_v12 }
 0x621   :  { %1696 = vmatpush3.bf16.msra.mxu1 %v2772_v15 }
 0x622   :  { %1703 = vmatprep.subr.bf16.mxu1 %v2321_v12 }
 0x6ef   :  { %v615_v40 = vpop.f32.mrb[0].mxu1 }
 0x6f0   :  { %v619_v41 = vadd.f32 %v615_v40, %v543_v39  ;;  %v1606_v42 = vpop.f32.mrb[1].mxu1 }
 0x6f2   :  { %1761 = vtanh.f32 %v619_v41  ;;  %v620_v44 = vmul.f32 0.5, %v619_v41 }
 0x6f4   :  { %1763 = vtanh.f32 %v620_v44 }
 0x6fc   :  { %v1762_v43 = vpop.eup %1761 }
 0x6fd   :  { %627 = vrot.lane.b32.xlu0 %v1762_v43, %s2320_s1 }
 0x6fe   :  { %v1764_v45 = vpop.eup %1763 }
 0x6ff   :  { %v622_v46 = vadd.f32 1.0, %v1764_v45 }
 0x701   :  { %v623_v47 = vmul.f32 0.5, %v622_v46 }
 0x703   :  { %v625_v50 = vmul.f32 %v623_v47, %v536_v34 }
 0x76f   :  { %v628_v48 = vpop.permute.xlu0 %627 }
 0x770   :  { %v630_v49 = vmul.f32 %v628_v48, %v623_v47 }
 0x772   :  { %632 = vrot.lane.b32.xlu1 %v630_v49, %s2324_s29  ;;  %v939_v49 = vld [vmem:[#allocation2 + $0x30] sm:$0xff] }
 0x7e4   :  { %v633_v51 = vpop.permute.xlu1 %632 }
 0x7e5   :  { %v635_v52 = vadd.f32 %v633_v51, %v625_v50 }
 0x7e7   :  { %1765 = vtanh.f32 %v635_v52 }
 0x7f1   :  { %v1766_v53 = vpop.eup %1765 }
 0x7f2   :  { %638 = vrot.lane.b32.xlu0 %v1766_v53, %s2320_s1 }
 0x864   :  { %v639_v54 = vpop.permute.xlu0 %638 }
 0x865   :  { %v641_v55 = vmul.f32 %v639_v54, %v623_v47 }
 0x867   :  { %644 = vrot.lane.b32.xlu1 %v641_v55, %s2324_s29 }
 0x8d9   :  { %v645_v56 = vpop.permute.xlu1 %644 }
 0x8da   :  { %1616 = vmatmul.mubr.msk.f32.vlgmr.msra.gmra.mrb[2].mxu0 %vm443_vm1, %v645_v56 }
 0x8db   :  { %1699 = vmatpush3.bf16.msra.mxu0 %v2764_v13  ;;  %1637 = vmatprep.mubr.msk.f32.mxu0 %vm2322_vm0, %v2303_v0 }
 0x8dc   :  { %1700 = vmatprep.subr.bf16.mxu0 %v2321_v12 }
 0x8df   :  { %1702 = vmatpush3.bf16.msra.mxu0 %v2772_v15 }
 0x8e0   :  { %1709 = vmatprep.subr.bf16.mxu0 %v2321_v12 }
 0x9ad   :  { %v714_v58 = vpop.f32.mrb[2].mxu0 }
 0x9ae   :  { %v718_v59 = vadd.f32 %v714_v58, %v642_v57  ;;  %v1617_v60 = vpop.f32.mrb[3].mxu0 }
 0x9b0   :  { %1767 = vtanh.f32 %v718_v59  ;;  %v719_v62 = vmul.f32 0.5, %v718_v59 }
 0x9b2   :  { %1769 = vtanh.f32 %v719_v62 }
 0x9ba   :  { %v1768_v61 = vpop.eup %1767 }
 0x9bb   :  { %726 = vrot.lane.b32.xlu0 %v1768_v61, %s2320_s1 }
 0x9bc   :  { %v1770_v63 = vpop.eup %1769 }
 0x9bd   :  { %v721_v1 = vadd.f32 1.0, %v1770_v63 }
 0x9bf   :  { %v722_v2 = vmul.f32 0.5, %v721_v1 }
 0x9c1   :  { %v724_v5 = vmul.f32 %v722_v2, %v635_v52 }
 0xa2d   :  { %v727_v3 = vpop.permute.xlu0 %726 }
 0xa2e   :  { %v729_v4 = vmul.f32 %v727_v3, %v722_v2  ;;  %v1038_v3 = vld [vmem:[#allocation2 + $0x38] sm:$0xff] }
 0xa30   :  { %731 = vrot.lane.b32.xlu1 %v729_v4, %s2324_s29 }
 0xaa2   :  { %v732_v6 = vpop.permute.xlu1 %731 }
 0xaa3   :  { %v734_v7 = vadd.f32 %v732_v6, %v724_v5 }
 0xaa5   :  { %1771 = vtanh.f32 %v734_v7 }
 0xaaf   :  { %v1772_v8 = vpop.eup %1771 }
 0xab0   :  { %737 = vrot.lane.b32.xlu0 %v1772_v8, %s2320_s1 }
 0xb22   :  { %v738_v9 = vpop.permute.xlu0 %737 }
 0xb23   :  { %v740_v10 = vmul.f32 %v738_v9, %v722_v2 }
 0xb25   :  { %743 = vrot.lane.b32.xlu1 %v740_v10, %s2324_s29 }
 0xb97   :  { %v744_v11 = vpop.permute.xlu1 %743 }
 0xb98   :  { %1627 = vmatmul.mubr.msk.f32.vlgmr.msra.gmra.mrb[2].mxu1 %vm443_vm1, %v744_v11 }
 0xb99   :  { %1705 = vmatpush3.bf16.msra.mxu1 %v2764_v13  ;;  %1648 = vmatprep.mubr.msk.f32.mxu1 %vm2322_vm0, %v2303_v0 }
 0xb9a   :  { %1706 = vmatprep.subr.bf16.mxu1 %v2321_v12 }
 0xb9d   :  { %1708 = vmatpush3.bf16.msra.mxu1 %v2772_v15 }
 0xb9e   :  { %1715 = vmatprep.subr.bf16.mxu1 %v2321_v12 }
 0xc6b   :  { %v813_v16 = vpop.f32.mrb[2].mxu1 }
 0xc6c   :  { %v817_v17 = vadd.f32 %v813_v16, %v741_v14  ;;  %v1628_v18 = vpop.f32.mrb[3].mxu1 }
 0xc6e   :  { %1773 = vtanh.f32 %v817_v17  ;;  %v818_v20 = vmul.f32 0.5, %v817_v17 }
 0xc70   :  { %1775 = vtanh.f32 %v818_v20  ;;  %v1137_v20 = vld [vmem:[#allocation8] sm:$0xff] }
 0xc78   :  { %v1774_v19 = vpop.eup %1773 }
 0xc79   :  { %825 = vrot.lane.b32.xlu0 %v1774_v19, %s2320_s1 }
 0xc7a   :  { %v1776_v21 = vpop.eup %1775 }
 0xc7b   :  { %v820_v22 = vadd.f32 1.0, %v1776_v21  ;;  %v1138_v21 = vld [vmem:[#allocation8 + $0x8] sm:$0xff] }
 0xc7d   :  { %v821_v23 = vmul.f32 0.5, %v820_v22  ;;  %v1139_v22 = vld [vmem:[#allocation8 + $0x10] sm:$0xff] }
 0xc7f   :  { %v823_v26 = vmul.f32 %v821_v23, %v734_v7 }
 0xceb   :  { %v826_v24 = vpop.permute.xlu0 %825 }
 0xcec   :  { %v828_v25 = vmul.f32 %v826_v24, %v821_v23  ;;  %v1140_v24 = vld [vmem:[#allocation8 + $0x18] sm:$0xff] }
 0xcee   :  { %830 = vrot.lane.b32.xlu1 %v828_v25, %s2324_s29  ;;  %v1719_v25 = vpack.c.bf16 %v1140_v24, %v1139_v22 }
 0xd60   :  { %v831_v27 = vpop.permute.xlu1 %830 }
 0xd61   :  { %v833_v28 = vadd.f32 %v831_v27, %v823_v26 }
 0xd63   :  { %1777 = vtanh.f32 %v833_v28 }
 0xd6d   :  { %v1778_v29 = vpop.eup %1777 }
 0xd6e   :  { %836 = vrot.lane.b32.xlu0 %v1778_v29, %s2320_s1 }
 0xde0   :  { %v837_v30 = vpop.permute.xlu0 %836 }
 0xde1   :  { %v839_v31 = vmul.f32 %v837_v30, %v821_v23  ;;  %v1716_v23 = vpack.c.bf16 %v1138_v21, %v1137_v20  ;;  %v1495_v30 = vld [vmem:[#allocation10] ss:$0 sm:$0xff] }
 0xde3   :  { %842 = vrot.lane.b32.xlu1 %v839_v31, %s2324_s29 }
 0xe55   :  { %v843_v32 = vpop.permute.xlu1 %842 }
 0xe56   :  { %1638 = vmatmul.mubr.msk.f32.vlgmr.msra.gmra.mrb[4].mxu0 %vm443_vm1, %v843_v32 }
 0xe57   :  { %1711 = vmatpush3.bf16.msra.mxu0 %v2764_v13  ;;  %1659 = vmatprep.mubr.msk.f32.mxu0 %vm2322_vm0, %v2303_v0 }
 0xe58   :  { %1712 = vmatprep.subr.bf16.mxu0 %v2321_v12 }
 0xe5b   :  { %1714 = vmatpush3.bf16.msra.mxu0 %v2772_v15 }
 0xf29   :  { %v912_v34 = vpop.f32.mrb[4].mxu0 }
 0xf2a   :  { %v916_v35 = vadd.f32 %v912_v34, %v840_v33  ;;  %v1639_v36 = vpop.f32.mrb[5].mxu0 }
 0xf2c   :  { %1779 = vtanh.f32 %v916_v35  ;;  %v917_v38 = vmul.f32 0.5, %v916_v35 }
 0xf2e   :  { %1781 = vtanh.f32 %v917_v38 }
 0xf36   :  { %v1780_v37 = vpop.eup %1779 }
 0xf37   :  { %924 = vrot.lane.b32.xlu0 %v1780_v37, %s2320_s1 }
 0xf38   :  { %v1782_v39 = vpop.eup %1781 }
 0xf39   :  { %v919_v40 = vadd.f32 1.0, %v1782_v39 }
 0xf3b   :  { %v920_v13 = vmul.f32 0.5, %v919_v40 }
 0xf3d   :  { %v922_v43 = vmul.f32 %v920_v13, %v833_v28 }
 0xfa9   :  { %v925_v41 = vpop.permute.xlu0 %924 }
 0xfaa   :  { %v927_v42 = vmul.f32 %v925_v41, %v920_v13 }
 0xfac   :  { %929 = vrot.lane.b32.xlu1 %v927_v42, %s2324_s29 }
0x101e   :  { %v930_v44 = vpop.permute.xlu1 %929 }
0x101f   :  { %v932_v15 = vadd.f32 %v930_v44, %v922_v43 }
0x1021   :  { %1783 = vtanh.f32 %v932_v15 }
0x102b   :  { %v1784_v45 = vpop.eup %1783 }
0x102c   :  { %935 = vrot.lane.b32.xlu0 %v1784_v45, %s2320_s1 }
0x109e   :  { %v936_v46 = vpop.permute.xlu0 %935 }
0x109f   :  { %v938_v47 = vmul.f32 %v936_v46, %v920_v13 }
0x10a1   :  { %941 = vrot.lane.b32.xlu1 %v938_v47, %s2324_s29 }
0x1113   :  { %v942_v48 = vpop.permute.xlu1 %941 }
0x1114   :  { %1649 = vmatmul.mubr.msk.f32.vlgmr.msra.gmra.mrb[4].mxu1 %vm443_vm1, %v942_v48 }
0x1115   :  { %1670 = vmatprep.mubr.msk.f32.mxu1 %vm2322_vm0, %v2303_v0  ;;  %1717 = vmatpush3.bf16.msra.mxu1 %v1716_v23 }
0x1116   :  { %1718 = vmatprep.subr.bf16.mxu1 %v2321_v12 }
0x1119   :  { %1720 = vmatpush3.bf16.msra.mxu1 %v1719_v25 }
0x11e7   :  { %v1011_v50 = vpop.f32.mrb[4].mxu1 }
0x11e8   :  { %v1015_v51 = vadd.f32 %v1011_v50, %v939_v49  ;;  %v1650_v52 = vpop.f32.mrb[5].mxu1 }
0x11ea   :  { %1785 = vtanh.f32 %v1015_v51  ;;  %v1016_v54 = vmul.f32 0.5, %v1015_v51 }
0x11ec   :  { %1787 = vtanh.f32 %v1016_v54 }
0x11f4   :  { %v1786_v53 = vpop.eup %1785 }
0x11f5   :  { %1023 = vrot.lane.b32.xlu0 %v1786_v53, %s2320_s1 }
0x11f6   :  { %v1788_v55 = vpop.eup %1787 }
0x11f7   :  { %v1018_v56 = vadd.f32 1.0, %v1788_v55 }
0x11f9   :  { %v1019_v57 = vmul.f32 0.5, %v1018_v56 }
0x11fb   :  { %v1021_v60 = vmul.f32 %v1019_v57, %v932_v15 }
0x1267   :  { %v1024_v58 = vpop.permute.xlu0 %1023 }
0x1268   :  { %v1026_v59 = vmul.f32 %v1024_v58, %v1019_v57 }
0x126a   :  { %1028 = vrot.lane.b32.xlu1 %v1026_v59, %s2324_s29 }
0x12dc   :  { %v1029_v61 = vpop.permute.xlu1 %1028 }
0x12dd   :  { %v1031_v0 = vadd.f32 %v1029_v61, %v1021_v60 }
0x12df   :  { %1789 = vtanh.f32 %v1031_v0 }
0x12e9   :  { %v1790_v62 = vpop.eup %1789 }
0x12ea   :  { %1034 = vrot.lane.b32.xlu0 %v1790_v62, %s2320_s1 }
0x135c   :  { %v1035_v63 = vpop.permute.xlu0 %1034 }
0x135d   :  { %v1037_v1 = vmul.f32 %v1035_v63, %v1019_v57 }
0x135f   :  { %1040 = vrot.lane.b32.xlu1 %v1037_v1, %s2324_s29 }
0x13d1   :  { %v1041_v2 = vpop.permute.xlu1 %1040 }
0x13d2   :  { %1660 = vmatmul.mubr.msk.f32.vlgmr.msra.gmra.mrb[6].mxu0 %vm443_vm1, %v1041_v2 }
0x14a5   :  { %v1110_v4 = vpop.f32.mrb[6].mxu0 }
0x14a6   :  { %v1114_v5 = vadd.f32 %v1110_v4, %v1038_v3  ;;  %v1661_v6 = vpop.f32.mrb[7].mxu0 }
0x14a8   :  { %1791 = vtanh.f32 %v1114_v5  ;;  %v1115_v8 = vmul.f32 0.5, %v1114_v5 }
0x14aa   :  { %1793 = vtanh.f32 %v1115_v8 }
0x14b2   :  { %v1792_v7 = vpop.eup %1791 }
0x14b3   :  { %1122 = vrot.lane.b32.xlu0 %v1792_v7, %s2320_s1 }
0x14b4   :  { %v1794_v9 = vpop.eup %1793 }
0x14b5   :  { %v1117_v10 = vadd.f32 1.0, %v1794_v9 }
0x14b7   :  { %v1118_v11 = vmul.f32 0.5, %v1117_v10 }
0x14b9   :  { %v1120_v17 = vmul.f32 %v1118_v11, %v1031_v0 }
0x1525   :  { %v1123_v14 = vpop.permute.xlu0 %1122 }
0x1526   :  { %v1125_v16 = vmul.f32 %v1123_v14, %v1118_v11 }
0x1528   :  { %1127 = vrot.lane.b32.xlu1 %v1125_v16, %s2324_s29 }
0x159a   :  { %v1128_v18 = vpop.permute.xlu1 %1127 }
0x159b   :  { %v1130_v19 = vadd.f32 %v1128_v18, %v1120_v17 }
0x159d   :  { %1795 = vtanh.f32 %v1130_v19 }
0x15a7   :  { %v1796_v26 = vpop.eup %1795 }
0x15a8   :  { %1133 = vrot.lane.b32.xlu0 %v1796_v26, %s2320_s1 }
0x161a   :  { %v1134_v27 = vpop.permute.xlu0 %1133 }
0x161b   :  { %v1136_v28 = vmul.f32 %v1134_v27, %v1118_v11 }
0x161d   :  { %1149 = vrot.lane.b32.xlu1 %v1136_v28, %s2324_s29 }
0x168f   :  { %v1150_v29 = vpop.permute.xlu1 %1149 }
0x1690   :  { %1671 = vmatmul.mubr.msk.f32.vlgmr.msra.gmra.mrb[6].mxu1 %vm443_vm1, %v1150_v29 }
0x1763   :  { %v1219_v31 = vpop.f32.mrb[6].mxu1 }
0x1764   :  { %v1220_v32 = vadd.f32 %v1495_v30, %v1219_v31  ;;  %v1672_v33 = vpop.f32.mrb[7].mxu1 }
0x1766   :  { %v1223_v34 = vmul.f32 0.5, %v1220_v32 }
0x1768   :  { %1797 = vtanh.f32 %v1223_v34 }
0x1772   :  { %v1798_v35 = vpop.eup %1797 }
0x1773   :  { %v1225_v36 = vadd.f32 1.0, %v1798_v35 }
0x1775   :  { %v1226_v12 = vmul.f32 0.5, %v1225_v36 }
0x1777   :  { %1227 = vst [vmem:[%s2859_s5] sm:$0xff] %v1226_v12 }
0x1778   :  { %1232 = vsyncpa [#allocation7], 1 }
0x1779   :  { %1233 = vsyncpa [#allocation9], 1 }
0x177a   :  { %1234 = vsyncmov [#allocation3] }
0x177d   :  { %s1235_s26 = vpop.sfrf %1234 }
0x177e   :  { %p1497_p0 = scmp.ne.s32.totalorder %s1235_s26, 0 }
0x1780   :  { %1239 = shalt.err (%p1497_p0)  }
0x1781   :  { %1241 = vsyncmov [#allocation3 + $0x1] }
0x1784   :  { %s1242_s17 = vpop.sfrf %1241 }
0x1785   :  { %p1498_p1 = scmp.ne.s32.totalorder %s1242_s17, 0 }
0x1787   :  { %1246 = shalt.err (%p1498_p1)  }
0x1788   :  { %1248 = vsyncmov [#allocation3 + $0x2] }
0x178b   :  { %s1249_s28 = vpop.sfrf %1248 }
0x178c   :  { %p1499_p3 = scmp.ne.s32.totalorder %s1249_s28, 0 }
0x178e   :  { %1253 = shalt.err (%p1499_p3)  }
0x178f   :  { %1255 = vsyncmov [#allocation3 + $0x3] }
0x1792   :  { %s1256_s30 = vpop.sfrf %1255 }
0x1793   :  { %p1500_p9 = scmp.ne.s32.totalorder %s1256_s30, 0 }
0x1795   :  { %1260 = shalt.err (%p1500_p9)  }
0x1796   :  { %1262 = vsyncmov [#allocation3 + $0x4] }
0x1799   :  { %s1263_s5 = vpop.sfrf %1262 }
0x179a   :  { %p1501_p7 = scmp.ne.s32.totalorder %s1263_s5, 0 }
0x179c   :  { %1267 = shalt.err (%p1501_p7)  }
0x179d   :  { %1269 = vsyncmov [#allocation3 + $0x5] }
0x17a0   :  { %s1270_s8 = vpop.sfrf %1269 }
0x17a1   :  { %p1502_p4 = scmp.ne.s32.totalorder %s1270_s8, 0 }
0x17a3   :  { %1274 = shalt.err (%p1502_p4)  }
0x17a4   :  { %1276 = vsyncmov [#allocation3 + $0x6] }
0x17a7   :  { %s1277_s16 = vpop.sfrf %1276 }
0x17a8   :  { %p1503_p6 = scmp.ne.s32.totalorder %s1277_s16, 0 }
0x17aa   :  { %1281 = shalt.err (%p1503_p6)  }
0x17ab   :  { %1283 = vsyncmov [#allocation3 + $0x7] }
0x17ae   :  { %s1284_s12 = vpop.sfrf %1283 }
0x17af   :  { %p1504_p5 = scmp.ne.s32.totalorder %s1284_s12, 0 }
0x17b1   :  { %1288 = shalt.err (%p1504_p5)  }
0x17b2   :  { %1290 = vsyncmov [#allocation3 + $0x8] }
0x17b5   :  { %s1291_s18 = vpop.sfrf %1290 }
0x17b6   :  { %p1505_p8 = scmp.ne.s32.totalorder %s1291_s18, 0 }
0x17b8   :  { %1295 = shalt.err (%p1505_p8)  }
0x17b9   :  { %1297 = vsyncmov [#allocation3 + $0x9] }
0x17bc   :  { %s1298_s10 = vpop.sfrf %1297 }
0x17bd   :  { %p1506_p2 = scmp.ne.s32.totalorder %s1298_s10, 0 }
0x17bf   :  { %1302 = shalt.err (%p1506_p2)  }
0x17c0   :  { %1304 = vsyncmov [#allocation3 + $0xa] }
0x17c3   :  { %s1305_s27 = vpop.sfrf %1304 }
0x17c4   :  { %p1507_p10 = scmp.ne.s32.totalorder %s1305_s27, 0 }
0x17c6   :  { %1309 = shalt.err (%p1507_p10)  }
0x17c7   :  { %1311 = vsyncmov [#allocation3 + $0xb] }
0x17ca   :  { %s1312_s11 = vpop.sfrf %1311 }
0x17cb   :  { %p1508_p11 = scmp.ne.s32.totalorder %s1312_s11, 0 }
0x17cd   :  { %1316 = shalt.err (%p1508_p11)  }
0x17ce   :  { %1318 = vsyncmov [#allocation3 + $0xc] }
0x17d1   :  { %s1319_s19 = vpop.sfrf %1318 }
0x17d2   :  { %p1509_p12 = scmp.ne.s32.totalorder %s1319_s19, 0 }
0x17d4   :  { %1323 = shalt.err (%p1509_p12)  }
0x17d5   :  { %1325 = vsyncmov [#allocation3 + $0xd] }
0x17d8   :  { %s1326_s20 = vpop.sfrf %1325 }
0x17d9   :  { %p1510_p13 = scmp.ne.s32.totalorder %s1326_s20, 0 }
0x17db   :  { %1330 = shalt.err (%p1510_p13)  }
0x17dc   :  { %1332 = vsyncmov [#allocation3 + $0xe] }
0x17df   :  { %s1333_s21 = vpop.sfrf %1332 }
0x17e0   :  { %p1511_p0 = scmp.ne.s32.totalorder %s1333_s21, 0 }
0x17e2   :  { %1337 = shalt.err (%p1511_p0)  }
0x17e3   :  { %1339 = vsyncmov [#allocation3 + $0xf] }
0x17e6   :  { %s1340_s13 = vpop.sfrf %1339 }
0x17e7   :  { %p1512_p1 = scmp.ne.s32.totalorder %s1340_s13, 0 }
0x17e9   :  { %1344 = shalt.err (%p1512_p1)  }

</bundles_post_ra>
